<compile_context>
chip_gen: v5e
topology: v5e:2x2
jax: 0.10.0
libtpu: 0.0.40
codegen_flags: <defaults>
</compile_context>

<pallas_src>
import functools

import jax
import jax.numpy as jnp
from jax import lax
from jax.experimental import pallas as pl
from jax.experimental.pallas import tpu as pltpu


def comparison_kernel(W, x1_ref, x2_ref, masks_ref, wp1_ref, wp2_ref, bp_ref,
                      w1_ref, b1_ref, w2_ref, b2_ref, out_ref):
    C, NHW = x1_ref.shape

    # ---- 1x1 projection over the concatenated channels + ReLU ----
    # wp @ [x1; x2] split into two (C, C) @ (C, NHW) matmuls -> no in-kernel concat.
    proj = (jnp.dot(wp1_ref[...], x1_ref[...], preferred_element_type=jnp.float32)
            + jnp.dot(wp2_ref[...], x2_ref[...], preferred_element_type=jnp.float32))
    proj = jnp.maximum(proj + bp_ref[...], 0.0)            # (C, N*H*W)

    # Border masks (0/1 f32), precomputed once in the wrapper, shared by both convs.
    masks = masks_ref[...]                                  # (9, N*H*W)

    def conv3x3_relu(x, w_ref, b_ref):
        # 3x3 SAME conv as 9 accumulated per-tap (C, C) @ (C, NHW) MXU matmuls.
        acc = jnp.dot(w_ref[4], x, preferred_element_type=jnp.float32)   # center tap
        for t in range(9):
            if t == 4:
                continue
            dh, dw = t // 3 - 1, t % 3 - 1
            off = dh * W + dw                               # flat lane shift of this tap
            shifted = pltpu.roll(x, (-off) % NHW, axis=1)   # XLU lane rotate
            acc = acc + jnp.dot(w_ref[t], shifted * masks[t:t + 1, :],
                                preferred_element_type=jnp.float32)
        return jnp.maximum(acc + b_ref[...], 0.0)           # (C, N*H*W)

    h1 = conv3x3_relu(proj, w1_ref, b1_ref)
    h2 = conv3x3_relu(h1, w2_ref, b2_ref)

    # Single lane-dense store of the full result.
    out_ref[...] = h2


def pack_params(params, N, H, W):
    """One-time repack of module parameters + border masks for the kernel.

    Call once at init (not per forward): weight transposes and mask construction are
    hoisted out of the per-call path.
    """
    wp, bp, w1, b1, w2, b2 = params
    C = bp.shape[0]
    HW = H * W

    wp_t = wp.T                                   # (Cout, 2*Cin)
    wp1 = wp_t[:, :C]                             # acts on in1 channels
    wp2 = wp_t[:, C:]                             # acts on in2 channels
    # HWIO (kh, kw, Cin, Cout) -> per-tap (Cout, Cin), tap index t = kh*3 + kw.
    w1_taps = jnp.transpose(w1, (0, 1, 3, 2)).reshape(9, C, C)
    w2_taps = jnp.transpose(w2, (0, 1, 3, 2)).reshape(9, C, C)
    bp_c, b1_c, b2_c = (b.reshape(C, 1) for b in (bp, b1, b2))

    # 3x3 SAME-padding border masks over the batch-folded lane axis (lane = n*HW + p).
    # They also neutralize circular-roll wrap-around across sample/slab boundaries.
    pos = jnp.arange(N * HW, dtype=jnp.int32) % HW
    h_idx, w_idx = pos // W, pos % W
    masks = jnp.stack(
        [((h_idx + dh >= 0) & (h_idx + dh < H) &
          (w_idx + dw >= 0) & (w_idx + dw < W)).astype(jnp.float32)
         for dh in (-1, 0, 1) for dw in (-1, 0, 1)], axis=0)        # (9, N*HW)

    return wp1, wp2, bp_c, w1_taps, b1_c, w2_taps, b2_c, masks


@jax.jit
def comparison_forward(in1, in2, packed):
    """in1, in2: NCHW float32 arrays. Returns NCHW float32."""
    N, C, H, W = in1.shape
    NHW = N * H * W
    wp1, wp2, bp_c, w1_taps, b1_c, w2_taps, b2_c, masks = packed

    # Fold batch onto the lane axis on the XLA side: (N, C, H, W) -> (C, N*H*W).
    x1 = in1.reshape(N, C, H * W).transpose(1, 0, 2).reshape(C, NHW)
    x2 = in2.reshape(N, C, H * W).transpose(1, 0, 2).reshape(C, NHW)

    vmem = pl.BlockSpec(memory_space=pltpu.MemorySpace.VMEM)   # whole array in VMEM
    out = pl.pallas_call(
        functools.partial(comparison_kernel, W),
        out_shape=jax.ShapeDtypeStruct((C, NHW), jnp.float32),
        in_specs=[vmem] * 10,
        out_specs=vmem,
        # grid=() : whole (tiny) problem in one kernel invocation, weights loaded once.
        compiler_params=pltpu.CompilerParams(vmem_limit_bytes=32 * 1024 * 1024),
    )(x1, x2, masks, wp1, wp2, bp_c, w1_taps, b1_c, w2_taps, b2_c)

    # Undo the batch fold (free reshape/transpose): (C, N*H*W) -> (N, C, H, W).
    return out.reshape(C, N, H, W).transpose(1, 0, 2, 3)


def init_params(key, dim):
    """Deterministic synthetic parameters matching the module's shapes.
    projection: Conv2d(2*dim, dim, 1); conv1/conv2: Conv2d(dim, dim, 3, pad=1).
    Stored as (Cin, Cout) / HWIO (kh, kw, Cin, Cout) / (Cout,) biases."""
    ks = jax.random.split(key, 6)
    wp = jax.random.normal(ks[0], (2 * dim, dim), jnp.float32) / jnp.sqrt(2.0 * dim)
    bp = jax.random.normal(ks[1], (dim,), jnp.float32) * 0.01
    std = jnp.sqrt(2.0 / (dim * 9))                   # kaiming_normal_
    w1 = jax.random.normal(ks[2], (3, 3, dim, dim), jnp.float32) * std
    b1 = jax.random.normal(ks[3], (dim,), jnp.float32) * 0.01
    w2 = jax.random.normal(ks[4], (3, 3, dim, dim), jnp.float32) * std
    b2 = jax.random.normal(ks[5], (dim,), jnp.float32) * 0.01
    return wp, bp, w1, b1, w2, b2


def reference_forward(in1, in2, params):
    """Pure-JAX reference (lax.conv) reproducing the PyTorch forward."""
    wp, bp, w1, b1, w2, b2 = params
    C = in1.shape[1]
    x = jnp.concatenate([in1, in2], axis=1)           # NCHW channel concat
    x = jnp.transpose(x, (0, 2, 3, 1))                # NHWC (reference only)
    dn = ('NHWC', 'HWIO', 'NHWC')
    y = lax.conv_general_dilated(x, wp.reshape(1, 1, 2 * C, C), (1, 1), 'SAME',
                                 dimension_numbers=dn) + bp.reshape(1, 1, 1, -1)
    y = jax.nn.relu(y)
    y = lax.conv_general_dilated(y, w1, (1, 1), 'SAME',
                                 dimension_numbers=dn) + b1.reshape(1, 1, 1, -1)
    y = jax.nn.relu(y)
    y = lax.conv_general_dilated(y, w2, (1, 1), 'SAME',
                                 dimension_numbers=dn) + b2.reshape(1, 1, 1, -1)
    y = jax.nn.relu(y)
    return jnp.transpose(y, (0, 3, 1, 2))             # back to NCHW


if __name__ == "__main__":
    key = jax.random.PRNGKey(0)
    k1, k2, kp = jax.random.split(key, 3)

    N, dim, H, W = 2, 4, 16, 16
    in1 = jax.random.normal(k1, (N, dim, H, W), jnp.float32)
    in2 = jax.random.normal(k2, (N, dim, H, W), jnp.float32)
    params = init_params(kp, dim)
    packed = pack_params(params, N, H, W)             # one-time repack + masks

    out = jax.block_until_ready(comparison_forward(in1, in2, packed))
    ref = jax.block_until_ready(reference_forward(in1, in2, params))

    assert out.shape == (N, dim, H, W)
    err = jnp.max(jnp.abs(out - ref))
    assert jnp.allclose(out, ref, rtol=1e-3, atol=1e-4), f"max abs err {err}"

    print("KERNEL_OK")
</pallas_src>

<mosaic_0001>
module attributes {stable_mosaic.version = 11 : i64} {
  func.func @comparison_kernel(%arg0: memref<4x512xf32, #tpu.memory_space<vmem>>, %arg1: memref<4x512xf32, #tpu.memory_space<vmem>>, %arg2: memref<9x512xf32, #tpu.memory_space<vmem>>, %arg3: memref<4x4xf32, #tpu.memory_space<vmem>>, %arg4: memref<4x4xf32, #tpu.memory_space<vmem>>, %arg5: memref<4x1xf32, #tpu.memory_space<vmem>>, %arg6: memref<9x4x4xf32, #tpu.memory_space<vmem>>, %arg7: memref<4x1xf32, #tpu.memory_space<vmem>>, %arg8: memref<9x4x4xf32, #tpu.memory_space<vmem>>, %arg9: memref<4x1xf32, #tpu.memory_space<vmem>>, %arg10: memref<4x512xf32, #tpu.memory_space<vmem>>) attributes {dimension_semantics = [], scalar_prefetch = 0 : i64, scratch_operands = 0 : i64, tpu.core_type = #tpu.core_type<tc>} {
    %c0 = arith.constant 0 : index
    %c0_0 = arith.constant 0 : index
    %0 = vector.load %arg3[%c0, %c0_0] : memref<4x4xf32, #tpu.memory_space<vmem>>, vector<4x4xf32>
    %c0_1 = arith.constant 0 : index
    %c0_2 = arith.constant 0 : index
    %1 = vector.load %arg0[%c0_1, %c0_2] : memref<4x512xf32, #tpu.memory_space<vmem>>, vector<4x512xf32>
    %cst = arith.constant dense<0.000000e+00> : vector<4x512xf32>
    %2 = tpu.matmul %0, %1, %cst {dimension_numbers = #tpu.dot_dimension_numbers<[1], [0], [0], [1], [0, 0, 1, 1], [], []>} : vector<4x4xf32>, vector<4x512xf32>, vector<4x512xf32> -> vector<4x512xf32>
    %c0_3 = arith.constant 0 : index
    %c0_4 = arith.constant 0 : index
    %3 = vector.load %arg4[%c0_3, %c0_4] : memref<4x4xf32, #tpu.memory_space<vmem>>, vector<4x4xf32>
    %c0_5 = arith.constant 0 : index
    %c0_6 = arith.constant 0 : index
    %4 = vector.load %arg1[%c0_5, %c0_6] : memref<4x512xf32, #tpu.memory_space<vmem>>, vector<4x512xf32>
    %cst_7 = arith.constant dense<0.000000e+00> : vector<4x512xf32>
    %5 = tpu.matmul %3, %4, %cst_7 {dimension_numbers = #tpu.dot_dimension_numbers<[1], [0], [0], [1], [0, 0, 1, 1], [], []>} : vector<4x4xf32>, vector<4x512xf32>, vector<4x512xf32> -> vector<4x512xf32>
    %6 = arith.addf %2, %5 : vector<4x512xf32>
    %c0_8 = arith.constant 0 : index
    %c0_9 = arith.constant 0 : index
    %7 = vector.load %arg5[%c0_8, %c0_9] : memref<4x1xf32, #tpu.memory_space<vmem>>, vector<4x1xf32>
    %8 = vector.broadcast %7 : vector<4x1xf32> to vector<4x512xf32>
    %9 = arith.addf %6, %8 : vector<4x512xf32>
    %cst_10 = arith.constant 0.000000e+00 : f32
    %10 = vector.broadcast %cst_10 : f32 to vector<4x512xf32>
    %11 = arith.maximumf %9, %10 : vector<4x512xf32>
    %c0_11 = arith.constant 0 : index
    %c0_12 = arith.constant 0 : index
    %12 = vector.load %arg2[%c0_11, %c0_12] : memref<9x512xf32, #tpu.memory_space<vmem>>, vector<9x512xf32>
    %c4 = arith.constant 4 : index
    %c0_13 = arith.constant 0 : index
    %c0_14 = arith.constant 0 : index
    %13 = vector.load %arg6[%c4, %c0_13, %c0_14] : memref<9x4x4xf32, #tpu.memory_space<vmem>>, vector<1x4x4xf32>
    %14 = vector.shape_cast %13 : vector<1x4x4xf32> to vector<4x4xf32>
    %cst_15 = arith.constant dense<0.000000e+00> : vector<4x512xf32>
    %15 = tpu.matmul %14, %11, %cst_15 {dimension_numbers = #tpu.dot_dimension_numbers<[1], [0], [0], [1], [0, 0, 1, 1], [], []>} : vector<4x4xf32>, vector<4x512xf32>, vector<4x512xf32> -> vector<4x512xf32>
    %c17_i32 = arith.constant 17 : i32
    %16 = tpu.dynamic_rotate %11 by %c17_i32 dim 1 : vector<4x512xf32>, i32 -> vector<4x512xf32>
    %c0_16 = arith.constant 0 : index
    %c0_17 = arith.constant 0 : index
    %c0_18 = arith.constant 0 : index
    %17 = vector.load %arg6[%c0_16, %c0_17, %c0_18] : memref<9x4x4xf32, #tpu.memory_space<vmem>>, vector<1x4x4xf32>
    %18 = vector.shape_cast %17 : vector<1x4x4xf32> to vector<4x4xf32>
    %19 = vector.extract_strided_slice %12 {offsets = [0, 0], sizes = [1, 512], strides = [1, 1]} : vector<9x512xf32> to vector<1x512xf32>
    %20 = vector.broadcast %19 : vector<1x512xf32> to vector<4x512xf32>
    %21 = arith.mulf %16, %20 : vector<4x512xf32>
    %cst_19 = arith.constant dense<0.000000e+00> : vector<4x512xf32>
    %22 = tpu.matmul %18, %21, %cst_19 {dimension_numbers = #tpu.dot_dimension_numbers<[1], [0], [0], [1], [0, 0, 1, 1], [], []>} : vector<4x4xf32>, vector<4x512xf32>, vector<4x512xf32> -> vector<4x512xf32>
    %23 = arith.addf %15, %22 : vector<4x512xf32>
    %c16_i32 = arith.constant 16 : i32
    %24 = tpu.dynamic_rotate %11 by %c16_i32 dim 1 : vector<4x512xf32>, i32 -> vector<4x512xf32>
    %c1 = arith.constant 1 : index
    %c0_20 = arith.constant 0 : index
    %c0_21 = arith.constant 0 : index
    %25 = vector.load %arg6[%c1, %c0_20, %c0_21] : memref<9x4x4xf32, #tpu.memory_space<vmem>>, vector<1x4x4xf32>
    %26 = vector.shape_cast %25 : vector<1x4x4xf32> to vector<4x4xf32>
    %27 = vector.extract_strided_slice %12 {offsets = [1, 0], sizes = [1, 512], strides = [1, 1]} : vector<9x512xf32> to vector<1x512xf32>
    %28 = vector.broadcast %27 : vector<1x512xf32> to vector<4x512xf32>
    %29 = arith.mulf %24, %28 : vector<4x512xf32>
    %cst_22 = arith.constant dense<0.000000e+00> : vector<4x512xf32>
    %30 = tpu.matmul %26, %29, %cst_22 {dimension_numbers = #tpu.dot_dimension_numbers<[1], [0], [0], [1], [0, 0, 1, 1], [], []>} : vector<4x4xf32>, vector<4x512xf32>, vector<4x512xf32> -> vector<4x512xf32>
    %31 = arith.addf %23, %30 : vector<4x512xf32>
    %c15_i32 = arith.constant 15 : i32
    %32 = tpu.dynamic_rotate %11 by %c15_i32 dim 1 : vector<4x512xf32>, i32 -> vector<4x512xf32>
    %c2 = arith.constant 2 : index
    %c0_23 = arith.constant 0 : index
    %c0_24 = arith.constant 0 : index
    %33 = vector.load %arg6[%c2, %c0_23, %c0_24] : memref<9x4x4xf32, #tpu.memory_space<vmem>>, vector<1x4x4xf32>
    %34 = vector.shape_cast %33 : vector<1x4x4xf32> to vector<4x4xf32>
    %35 = vector.extract_strided_slice %12 {offsets = [2, 0], sizes = [1, 512], strides = [1, 1]} : vector<9x512xf32> to vector<1x512xf32>
    %36 = vector.broadcast %35 : vector<1x512xf32> to vector<4x512xf32>
    %37 = arith.mulf %32, %36 : vector<4x512xf32>
    %cst_25 = arith.constant dense<0.000000e+00> : vector<4x512xf32>
    %38 = tpu.matmul %34, %37, %cst_25 {dimension_numbers = #tpu.dot_dimension_numbers<[1], [0], [0], [1], [0, 0, 1, 1], [], []>} : vector<4x4xf32>, vector<4x512xf32>, vector<4x512xf32> -> vector<4x512xf32>
    %39 = arith.addf %31, %38 : vector<4x512xf32>
    %c1_i32 = arith.constant 1 : i32
    %40 = tpu.dynamic_rotate %11 by %c1_i32 dim 1 : vector<4x512xf32>, i32 -> vector<4x512xf32>
    %c3 = arith.constant 3 : index
    %c0_26 = arith.constant 0 : index
    %c0_27 = arith.constant 0 : index
    %41 = vector.load %arg6[%c3, %c0_26, %c0_27] : memref<9x4x4xf32, #tpu.memory_space<vmem>>, vector<1x4x4xf32>
    %42 = vector.shape_cast %41 : vector<1x4x4xf32> to vector<4x4xf32>
    %43 = vector.extract_strided_slice %12 {offsets = [3, 0], sizes = [1, 512], strides = [1, 1]} : vector<9x512xf32> to vector<1x512xf32>
    %44 = vector.broadcast %43 : vector<1x512xf32> to vector<4x512xf32>
    %45 = arith.mulf %40, %44 : vector<4x512xf32>
    %cst_28 = arith.constant dense<0.000000e+00> : vector<4x512xf32>
    %46 = tpu.matmul %42, %45, %cst_28 {dimension_numbers = #tpu.dot_dimension_numbers<[1], [0], [0], [1], [0, 0, 1, 1], [], []>} : vector<4x4xf32>, vector<4x512xf32>, vector<4x512xf32> -> vector<4x512xf32>
    %47 = arith.addf %39, %46 : vector<4x512xf32>
    %c511_i32 = arith.constant 511 : i32
    %48 = tpu.dynamic_rotate %11 by %c511_i32 dim 1 : vector<4x512xf32>, i32 -> vector<4x512xf32>
    %c5 = arith.constant 5 : index
    %c0_29 = arith.constant 0 : index
    %c0_30 = arith.constant 0 : index
    %49 = vector.load %arg6[%c5, %c0_29, %c0_30] : memref<9x4x4xf32, #tpu.memory_space<vmem>>, vector<1x4x4xf32>
    %50 = vector.shape_cast %49 : vector<1x4x4xf32> to vector<4x4xf32>
    %51 = vector.extract_strided_slice %12 {offsets = [5, 0], sizes = [1, 512], strides = [1, 1]} : vector<9x512xf32> to vector<1x512xf32>
    %52 = vector.broadcast %51 : vector<1x512xf32> to vector<4x512xf32>
    %53 = arith.mulf %48, %52 : vector<4x512xf32>
    %cst_31 = arith.constant dense<0.000000e+00> : vector<4x512xf32>
    %54 = tpu.matmul %50, %53, %cst_31 {dimension_numbers = #tpu.dot_dimension_numbers<[1], [0], [0], [1], [0, 0, 1, 1], [], []>} : vector<4x4xf32>, vector<4x512xf32>, vector<4x512xf32> -> vector<4x512xf32>
    %55 = arith.addf %47, %54 : vector<4x512xf32>
    %c497_i32 = arith.constant 497 : i32
    %56 = tpu.dynamic_rotate %11 by %c497_i32 dim 1 : vector<4x512xf32>, i32 -> vector<4x512xf32>
    %c6 = arith.constant 6 : index
    %c0_32 = arith.constant 0 : index
    %c0_33 = arith.constant 0 : index
    %57 = vector.load %arg6[%c6, %c0_32, %c0_33] : memref<9x4x4xf32, #tpu.memory_space<vmem>>, vector<1x4x4xf32>
    %58 = vector.shape_cast %57 : vector<1x4x4xf32> to vector<4x4xf32>
    %59 = vector.extract_strided_slice %12 {offsets = [6, 0], sizes = [1, 512], strides = [1, 1]} : vector<9x512xf32> to vector<1x512xf32>
    %60 = vector.broadcast %59 : vector<1x512xf32> to vector<4x512xf32>
    %61 = arith.mulf %56, %60 : vector<4x512xf32>
    %cst_34 = arith.constant dense<0.000000e+00> : vector<4x512xf32>
    %62 = tpu.matmul %58, %61, %cst_34 {dimension_numbers = #tpu.dot_dimension_numbers<[1], [0], [0], [1], [0, 0, 1, 1], [], []>} : vector<4x4xf32>, vector<4x512xf32>, vector<4x512xf32> -> vector<4x512xf32>
    %63 = arith.addf %55, %62 : vector<4x512xf32>
    %c496_i32 = arith.constant 496 : i32
    %64 = tpu.dynamic_rotate %11 by %c496_i32 dim 1 : vector<4x512xf32>, i32 -> vector<4x512xf32>
    %c7 = arith.constant 7 : index
    %c0_35 = arith.constant 0 : index
    %c0_36 = arith.constant 0 : index
    %65 = vector.load %arg6[%c7, %c0_35, %c0_36] : memref<9x4x4xf32, #tpu.memory_space<vmem>>, vector<1x4x4xf32>
    %66 = vector.shape_cast %65 : vector<1x4x4xf32> to vector<4x4xf32>
    %67 = vector.extract_strided_slice %12 {offsets = [7, 0], sizes = [1, 512], strides = [1, 1]} : vector<9x512xf32> to vector<1x512xf32>
    %68 = vector.broadcast %67 : vector<1x512xf32> to vector<4x512xf32>
    %69 = arith.mulf %64, %68 : vector<4x512xf32>
    %cst_37 = arith.constant dense<0.000000e+00> : vector<4x512xf32>
    %70 = tpu.matmul %66, %69, %cst_37 {dimension_numbers = #tpu.dot_dimension_numbers<[1], [0], [0], [1], [0, 0, 1, 1], [], []>} : vector<4x4xf32>, vector<4x512xf32>, vector<4x512xf32> -> vector<4x512xf32>
    %71 = arith.addf %63, %70 : vector<4x512xf32>
    %c495_i32 = arith.constant 495 : i32
    %72 = tpu.dynamic_rotate %11 by %c495_i32 dim 1 : vector<4x512xf32>, i32 -> vector<4x512xf32>
    %c8 = arith.constant 8 : index
    %c0_38 = arith.constant 0 : index
    %c0_39 = arith.constant 0 : index
    %73 = vector.load %arg6[%c8, %c0_38, %c0_39] : memref<9x4x4xf32, #tpu.memory_space<vmem>>, vector<1x4x4xf32>
    %74 = vector.shape_cast %73 : vector<1x4x4xf32> to vector<4x4xf32>
    %75 = vector.extract_strided_slice %12 {offsets = [8, 0], sizes = [1, 512], strides = [1, 1]} : vector<9x512xf32> to vector<1x512xf32>
    %76 = vector.broadcast %75 : vector<1x512xf32> to vector<4x512xf32>
    %77 = arith.mulf %72, %76 : vector<4x512xf32>
    %cst_40 = arith.constant dense<0.000000e+00> : vector<4x512xf32>
    %78 = tpu.matmul %74, %77, %cst_40 {dimension_numbers = #tpu.dot_dimension_numbers<[1], [0], [0], [1], [0, 0, 1, 1], [], []>} : vector<4x4xf32>, vector<4x512xf32>, vector<4x512xf32> -> vector<4x512xf32>
    %79 = arith.addf %71, %78 : vector<4x512xf32>
    %c0_41 = arith.constant 0 : index
    %c0_42 = arith.constant 0 : index
    %80 = vector.load %arg7[%c0_41, %c0_42] : memref<4x1xf32, #tpu.memory_space<vmem>>, vector<4x1xf32>
    %81 = vector.broadcast %80 : vector<4x1xf32> to vector<4x512xf32>
    %82 = arith.addf %79, %81 : vector<4x512xf32>
    %cst_43 = arith.constant 0.000000e+00 : f32
    %83 = vector.broadcast %cst_43 : f32 to vector<4x512xf32>
    %84 = arith.maximumf %82, %83 : vector<4x512xf32>
    %c4_44 = arith.constant 4 : index
    %c0_45 = arith.constant 0 : index
    %c0_46 = arith.constant 0 : index
    %85 = vector.load %arg8[%c4_44, %c0_45, %c0_46] : memref<9x4x4xf32, #tpu.memory_space<vmem>>, vector<1x4x4xf32>
    %86 = vector.shape_cast %85 : vector<1x4x4xf32> to vector<4x4xf32>
    %cst_47 = arith.constant dense<0.000000e+00> : vector<4x512xf32>
    %87 = tpu.matmul %86, %84, %cst_47 {dimension_numbers = #tpu.dot_dimension_numbers<[1], [0], [0], [1], [0, 0, 1, 1], [], []>} : vector<4x4xf32>, vector<4x512xf32>, vector<4x512xf32> -> vector<4x512xf32>
    %c17_i32_48 = arith.constant 17 : i32
    %88 = tpu.dynamic_rotate %84 by %c17_i32_48 dim 1 : vector<4x512xf32>, i32 -> vector<4x512xf32>
    %c0_49 = arith.constant 0 : index
    %c0_50 = arith.constant 0 : index
    %c0_51 = arith.constant 0 : index
    %89 = vector.load %arg8[%c0_49, %c0_50, %c0_51] : memref<9x4x4xf32, #tpu.memory_space<vmem>>, vector<1x4x4xf32>
    %90 = vector.shape_cast %89 : vector<1x4x4xf32> to vector<4x4xf32>
    %91 = vector.extract_strided_slice %12 {offsets = [0, 0], sizes = [1, 512], strides = [1, 1]} : vector<9x512xf32> to vector<1x512xf32>
    %92 = vector.broadcast %91 : vector<1x512xf32> to vector<4x512xf32>
    %93 = arith.mulf %88, %92 : vector<4x512xf32>
    %cst_52 = arith.constant dense<0.000000e+00> : vector<4x512xf32>
    %94 = tpu.matmul %90, %93, %cst_52 {dimension_numbers = #tpu.dot_dimension_numbers<[1], [0], [0], [1], [0, 0, 1, 1], [], []>} : vector<4x4xf32>, vector<4x512xf32>, vector<4x512xf32> -> vector<4x512xf32>
    %95 = arith.addf %87, %94 : vector<4x512xf32>
    %c16_i32_53 = arith.constant 16 : i32
    %96 = tpu.dynamic_rotate %84 by %c16_i32_53 dim 1 : vector<4x512xf32>, i32 -> vector<4x512xf32>
    %c1_54 = arith.constant 1 : index
    %c0_55 = arith.constant 0 : index
    %c0_56 = arith.constant 0 : index
    %97 = vector.load %arg8[%c1_54, %c0_55, %c0_56] : memref<9x4x4xf32, #tpu.memory_space<vmem>>, vector<1x4x4xf32>
    %98 = vector.shape_cast %97 : vector<1x4x4xf32> to vector<4x4xf32>
    %99 = vector.extract_strided_slice %12 {offsets = [1, 0], sizes = [1, 512], strides = [1, 1]} : vector<9x512xf32> to vector<1x512xf32>
    %100 = vector.broadcast %99 : vector<1x512xf32> to vector<4x512xf32>
    %101 = arith.mulf %96, %100 : vector<4x512xf32>
    %cst_57 = arith.constant dense<0.000000e+00> : vector<4x512xf32>
    %102 = tpu.matmul %98, %101, %cst_57 {dimension_numbers = #tpu.dot_dimension_numbers<[1], [0], [0], [1], [0, 0, 1, 1], [], []>} : vector<4x4xf32>, vector<4x512xf32>, vector<4x512xf32> -> vector<4x512xf32>
    %103 = arith.addf %95, %102 : vector<4x512xf32>
    %c15_i32_58 = arith.constant 15 : i32
    %104 = tpu.dynamic_rotate %84 by %c15_i32_58 dim 1 : vector<4x512xf32>, i32 -> vector<4x512xf32>
    %c2_59 = arith.constant 2 : index
    %c0_60 = arith.constant 0 : index
    %c0_61 = arith.constant 0 : index
    %105 = vector.load %arg8[%c2_59, %c0_60, %c0_61] : memref<9x4x4xf32, #tpu.memory_space<vmem>>, vector<1x4x4xf32>
    %106 = vector.shape_cast %105 : vector<1x4x4xf32> to vector<4x4xf32>
    %107 = vector.extract_strided_slice %12 {offsets = [2, 0], sizes = [1, 512], strides = [1, 1]} : vector<9x512xf32> to vector<1x512xf32>
    %108 = vector.broadcast %107 : vector<1x512xf32> to vector<4x512xf32>
    %109 = arith.mulf %104, %108 : vector<4x512xf32>
    %cst_62 = arith.constant dense<0.000000e+00> : vector<4x512xf32>
    %110 = tpu.matmul %106, %109, %cst_62 {dimension_numbers = #tpu.dot_dimension_numbers<[1], [0], [0], [1], [0, 0, 1, 1], [], []>} : vector<4x4xf32>, vector<4x512xf32>, vector<4x512xf32> -> vector<4x512xf32>
    %111 = arith.addf %103, %110 : vector<4x512xf32>
    %c1_i32_63 = arith.constant 1 : i32
    %112 = tpu.dynamic_rotate %84 by %c1_i32_63 dim 1 : vector<4x512xf32>, i32 -> vector<4x512xf32>
    %c3_64 = arith.constant 3 : index
    %c0_65 = arith.constant 0 : index
    %c0_66 = arith.constant 0 : index
    %113 = vector.load %arg8[%c3_64, %c0_65, %c0_66] : memref<9x4x4xf32, #tpu.memory_space<vmem>>, vector<1x4x4xf32>
    %114 = vector.shape_cast %113 : vector<1x4x4xf32> to vector<4x4xf32>
    %115 = vector.extract_strided_slice %12 {offsets = [3, 0], sizes = [1, 512], strides = [1, 1]} : vector<9x512xf32> to vector<1x512xf32>
    %116 = vector.broadcast %115 : vector<1x512xf32> to vector<4x512xf32>
    %117 = arith.mulf %112, %116 : vector<4x512xf32>
    %cst_67 = arith.constant dense<0.000000e+00> : vector<4x512xf32>
    %118 = tpu.matmul %114, %117, %cst_67 {dimension_numbers = #tpu.dot_dimension_numbers<[1], [0], [0], [1], [0, 0, 1, 1], [], []>} : vector<4x4xf32>, vector<4x512xf32>, vector<4x512xf32> -> vector<4x512xf32>
    %119 = arith.addf %111, %118 : vector<4x512xf32>
    %c511_i32_68 = arith.constant 511 : i32
    %120 = tpu.dynamic_rotate %84 by %c511_i32_68 dim 1 : vector<4x512xf32>, i32 -> vector<4x512xf32>
    %c5_69 = arith.constant 5 : index
    %c0_70 = arith.constant 0 : index
    %c0_71 = arith.constant 0 : index
    %121 = vector.load %arg8[%c5_69, %c0_70, %c0_71] : memref<9x4x4xf32, #tpu.memory_space<vmem>>, vector<1x4x4xf32>
    %122 = vector.shape_cast %121 : vector<1x4x4xf32> to vector<4x4xf32>
    %123 = vector.extract_strided_slice %12 {offsets = [5, 0], sizes = [1, 512], strides = [1, 1]} : vector<9x512xf32> to vector<1x512xf32>
    %124 = vector.broadcast %123 : vector<1x512xf32> to vector<4x512xf32>
    %125 = arith.mulf %120, %124 : vector<4x512xf32>
    %cst_72 = arith.constant dense<0.000000e+00> : vector<4x512xf32>
    %126 = tpu.matmul %122, %125, %cst_72 {dimension_numbers = #tpu.dot_dimension_numbers<[1], [0], [0], [1], [0, 0, 1, 1], [], []>} : vector<4x4xf32>, vector<4x512xf32>, vector<4x512xf32> -> vector<4x512xf32>
    %127 = arith.addf %119, %126 : vector<4x512xf32>
    %c497_i32_73 = arith.constant 497 : i32
    %128 = tpu.dynamic_rotate %84 by %c497_i32_73 dim 1 : vector<4x512xf32>, i32 -> vector<4x512xf32>
    %c6_74 = arith.constant 6 : index
    %c0_75 = arith.constant 0 : index
    %c0_76 = arith.constant 0 : index
    %129 = vector.load %arg8[%c6_74, %c0_75, %c0_76] : memref<9x4x4xf32, #tpu.memory_space<vmem>>, vector<1x4x4xf32>
    %130 = vector.shape_cast %129 : vector<1x4x4xf32> to vector<4x4xf32>
    %131 = vector.extract_strided_slice %12 {offsets = [6, 0], sizes = [1, 512], strides = [1, 1]} : vector<9x512xf32> to vector<1x512xf32>
    %132 = vector.broadcast %131 : vector<1x512xf32> to vector<4x512xf32>
    %133 = arith.mulf %128, %132 : vector<4x512xf32>
    %cst_77 = arith.constant dense<0.000000e+00> : vector<4x512xf32>
    %134 = tpu.matmul %130, %133, %cst_77 {dimension_numbers = #tpu.dot_dimension_numbers<[1], [0], [0], [1], [0, 0, 1, 1], [], []>} : vector<4x4xf32>, vector<4x512xf32>, vector<4x512xf32> -> vector<4x512xf32>
    %135 = arith.addf %127, %134 : vector<4x512xf32>
    %c496_i32_78 = arith.constant 496 : i32
    %136 = tpu.dynamic_rotate %84 by %c496_i32_78 dim 1 : vector<4x512xf32>, i32 -> vector<4x512xf32>
    %c7_79 = arith.constant 7 : index
    %c0_80 = arith.constant 0 : index
    %c0_81 = arith.constant 0 : index
    %137 = vector.load %arg8[%c7_79, %c0_80, %c0_81] : memref<9x4x4xf32, #tpu.memory_space<vmem>>, vector<1x4x4xf32>
    %138 = vector.shape_cast %137 : vector<1x4x4xf32> to vector<4x4xf32>
    %139 = vector.extract_strided_slice %12 {offsets = [7, 0], sizes = [1, 512], strides = [1, 1]} : vector<9x512xf32> to vector<1x512xf32>
    %140 = vector.broadcast %139 : vector<1x512xf32> to vector<4x512xf32>
    %141 = arith.mulf %136, %140 : vector<4x512xf32>
    %cst_82 = arith.constant dense<0.000000e+00> : vector<4x512xf32>
    %142 = tpu.matmul %138, %141, %cst_82 {dimension_numbers = #tpu.dot_dimension_numbers<[1], [0], [0], [1], [0, 0, 1, 1], [], []>} : vector<4x4xf32>, vector<4x512xf32>, vector<4x512xf32> -> vector<4x512xf32>
    %143 = arith.addf %135, %142 : vector<4x512xf32>
    %c495_i32_83 = arith.constant 495 : i32
    %144 = tpu.dynamic_rotate %84 by %c495_i32_83 dim 1 : vector<4x512xf32>, i32 -> vector<4x512xf32>
    %c8_84 = arith.constant 8 : index
    %c0_85 = arith.constant 0 : index
    %c0_86 = arith.constant 0 : index
    %145 = vector.load %arg8[%c8_84, %c0_85, %c0_86] : memref<9x4x4xf32, #tpu.memory_space<vmem>>, vector<1x4x4xf32>
    %146 = vector.shape_cast %145 : vector<1x4x4xf32> to vector<4x4xf32>
    %147 = vector.extract_strided_slice %12 {offsets = [8, 0], sizes = [1, 512], strides = [1, 1]} : vector<9x512xf32> to vector<1x512xf32>
    %148 = vector.broadcast %147 : vector<1x512xf32> to vector<4x512xf32>
    %149 = arith.mulf %144, %148 : vector<4x512xf32>
    %cst_87 = arith.constant dense<0.000000e+00> : vector<4x512xf32>
    %150 = tpu.matmul %146, %149, %cst_87 {dimension_numbers = #tpu.dot_dimension_numbers<[1], [0], [0], [1], [0, 0, 1, 1], [], []>} : vector<4x4xf32>, vector<4x512xf32>, vector<4x512xf32> -> vector<4x512xf32>
    %151 = arith.addf %143, %150 : vector<4x512xf32>
    %c0_88 = arith.constant 0 : index
    %c0_89 = arith.constant 0 : index
    %152 = vector.load %arg9[%c0_88, %c0_89] : memref<4x1xf32, #tpu.memory_space<vmem>>, vector<4x1xf32>
    %153 = vector.broadcast %152 : vector<4x1xf32> to vector<4x512xf32>
    %154 = arith.addf %151, %153 : vector<4x512xf32>
    %cst_90 = arith.constant 0.000000e+00 : f32
    %155 = vector.broadcast %cst_90 : f32 to vector<4x512xf32>
    %156 = arith.maximumf %154, %155 : vector<4x512xf32>
    %c0_91 = arith.constant 0 : index
    %c0_92 = arith.constant 0 : index
    %157 = vector.load %arg10[%c0_91, %c0_92] : memref<4x512xf32, #tpu.memory_space<vmem>>, vector<4x512xf32>
    tpu.vector_store %arg10[%c0_91, %c0_92], %156 {strides = array<i32>} : memref<4x512xf32, #tpu.memory_space<vmem>>, vector<4x512xf32>,
    return
  }
}

</mosaic_0001>

<bundles_post_ra>
// kernel: comparison_forward.1
= control target key start
LH: loop header
LB: loop body
LE: loop exit
PB: predicated region body
PF: predicated region fallthrough
CT: control target
= control target key end

     0   :  { %v2597_v2 = vmov 0   ;;  %vm54_vm0 = vcmask 1043456   ;;  %vm50_vm1 = vcmask 31744   ;;  %s2600_s24 = smov 16   ;;  %s2601_s25 = smov 15   ;;  %v275_v40 = vlaneseq  ;;  %s3418_s1 = inlined_call_operand.vmem [shape: f32[4,512], index: 1, kind: input, shape index: {}]   ;;  %s3419_s5 = inlined_call_operand.vmem [shape: f32[4,1], index: 5, kind: input, shape index: {}]   ;;  %s3420_s0 = inlined_call_operand.vmem [shape: f32[4,512], index: 0, kind: input, shape index: {}]   ;;  %s3421_s4 = inlined_call_operand.vmem [shape: f32[4,4], index: 4, kind: input, shape index: {}]   ;;  %s3422_s3 = inlined_call_operand.vmem [shape: f32[4,4], index: 3, kind: input, shape index: {}]   ;;  %s3423_s2 = inlined_call_operand.vmem [shape: f32[9,512], index: 2, kind: input, shape index: {}]   ;;  %s3424_s7 = inlined_call_operand.vmem [shape: f32[4,1], index: 7, kind: input, shape index: {}]   ;;  %s3425_s6 = inlined_call_operand.vmem [shape: f32[9,4,4], index: 6, kind: input, shape index: {}]   ;;  %s3426_s9 = inlined_call_operand.vmem [shape: f32[4,1], index: 9, kind: input, shape index: {}]   ;;  %s3427_s8 = inlined_call_operand.vmem [shape: f32[9,4,4], index: 8, kind: input, shape index: {}]   ;;  %s3428_s10 = inlined_call_operand.vmem [shape: f32[4,512], index: 10, kind: output, shape index: {}]  }
   0x1   :  { %v39_v0 = vld [vmem:[%s3418_s1] sm:$0xff]  ;;  %v40_v1 = vld [vmem:[%s3418_s1 + $0x8] sm:$0xff]  ;;  %2592 = vset.pattern.permute.xlu0 %v2597_v2  ;;  %s2602_s26 = smov 127   ;;  %s2603_s27 = smov 113   ;;  %v2806_v53 = vld [vmem:[%s3423_s2 + $0x10] sm:$0xff] }
   0x2   :  { %43 = vst [vmem:[#allocation1] ss:$2 sm:$0xff] %v39_v0  ;;  %v243_v3 = vld [vmem:[%s3419_s5] sm:$0xf]  ;;  %v37_v5 = vld [vmem:[%s3420_s0 + $0x8] sm:$0xff]  ;;  %s2599_s5 = smov 1  }
   0x3   :  { %45 = vst [vmem:[#allocation1 + $0x10] ss:$2 sm:$0xff] %v40_v1  ;;  %246 = vperm.xlu0 %2592, %v243_v3   ;;  %v36_v4 = vld [vmem:[%s3420_s0] sm:$0xff]  ;;  %s2604_s28 = smov 112   ;;  %s2605_s29 = smov 111   ;;  %v2777_v42 = vand.u32 127, %v275_v40 }
   0x4   :  { %v38_v6 = vld [vmem:[%s3421_s4] sm:$0xf]  ;;  %v2782_v43 = vld [vmem:[%s3423_s2 + $0x8] sm:$0xff]  ;;  %v285_v55 = vperm.slane %v2806_v53, 0  ;;  %v2423_v61 = vld [vmem:[%s3425_s6 + $0x10] sm:$0xf] }
   0x5   :  { %v35_v11 = vld [vmem:[%s3422_s3] sm:$0xf]  ;;  %s2598_s3 = smov 17   ;;  %vm277_vm2 = vcmp.lt.s32.totalorder %v2777_v42, 17  ;;  %v284_v44 = vperm.slane %v2782_v43, 0  ;;  %vm489_vm3 = vcmp.lt.s32.totalorder %v2777_v42, 16 }
   0x6   :  { %v1335_v37 = vld [vmem:[%s3424_s7] sm:$0xf]  ;;  %v497_v48 = vperm.slane %v2782_v43, 1  ;;  %v2835_v63 = vld [vmem:[%s3423_s2 + $0x18] sm:$0xff]  ;;  %vm611_vm4 = vcmp.lt.s32.totalorder %v2777_v42, 15  ;;  %v619_v2 = vperm.slane %v2782_v43, 2 }
   0x7   :  { %v282_v52 = vld [vmem:[%s3425_s6] sm:$0xf]  ;;  %v286_v1 = vperm.slane %v2835_v63, 0  ;;  %vm733_vm5 = vcmp.lt.s32.totalorder %v2777_v42, 1  ;;  %v3441_v40 = vperm.slane %v2806_v53, 3  ;;  %vm855_vm6 = vcmp.lt.s32.totalorder %v2777_v42, 127 }
   0x8   :  { %v2830_v62 = vld [vmem:[%s3423_s2] sm:$0xff]  ;;  %vm977_vm7 = vcmp.lt.s32.totalorder %v2777_v42, 113  ;;  %vm1099_vm8 = vcmp.lt.s32.totalorder %v2777_v42, 112  ;;  %vm1221_vm9 = vcmp.lt.s32.totalorder %v2777_v42, 111 }
   0x9   :  { %v46_v7 = vld.sshfl [vmem:[#allocation1] sm:$0xff pattern:$0x75316420]  ;;  %v47_v8 = vld.sshfl [vmem:[#allocation1 + $0x8] sm:$0xff pattern:$0x75316420] }
   0xa   :  { %2407 = vmatpush.msk.msra.mxu0 %vm54_vm0, %v46_v7  ;;  %2409 = vmatpush.msk.msra.mxu1 %vm54_vm0, %v47_v8  ;;  %145 = vst [vmem:[#allocation1] ss:$2 sm:$0xff] %v36_v4  ;;  %v48_v9 = vld.sshfl [vmem:[#allocation1 + $0x10] sm:$0xff pattern:$0x75316420]  ;;  %v283_v0 = vperm.slane %v2830_v62, 0 }
   0xb   :  { %2411 = vmatpush.msk.msra.mxu2 %vm54_vm0, %v48_v9  ;;  %v49_v10 = vld.sshfl [vmem:[#allocation1 + $0x18] sm:$0xff pattern:$0x75316420]  ;;  %2408 = vmatmul.msk.f32.vlgmr.msra.gmra.mxu0 %vm50_vm1, %v38_v6 }
   0xc   :  { %2413 = vmatpush.msk.msra.mxu3 %vm54_vm0, %v49_v10  ;;  %147 = vst [vmem:[#allocation1 + $0x10] ss:$2 sm:$0xff] %v37_v5  ;;  %2410 = vmatmul.msk.f32.vlgmr.msra.gmra.mxu1 %vm50_vm1, %v38_v6 }
   0xd   :  { %2412 = vmatmul.msk.f32.vlgmr.msra.gmra.mxu2 %vm50_vm1, %v38_v6  ;;  %2414 = vmatmul.msk.f32.vlgmr.msra.gmra.mxu3 %vm50_vm1, %v38_v6 }
  0x11   :  { %v148_v12 = vld.sshfl [vmem:[#allocation1] sm:$0xff pattern:$0x75316420]  ;;  %v149_v13 = vld.sshfl [vmem:[#allocation1 + $0x8] sm:$0xff pattern:$0x75316420] }
  0x12   :  { %2415 = vmatpush.msk.msrb.mxu0 %vm54_vm0, %v148_v12  ;;  %2417 = vmatpush.msk.msrb.mxu1 %vm54_vm0, %v149_v13  ;;  %v2440_v12 = vld [vmem:[%s3425_s6 + $0x4] sm:$0xf]  ;;  %v741_v13 = vperm.slane %v2782_v43, 3 }
  0x13   :  { %v150_v14 = vld.sshfl [vmem:[#allocation1 + $0x10] sm:$0xff pattern:$0x75316420]  ;;  %v151_v15 = vld.sshfl [vmem:[#allocation1 + $0x18] sm:$0xff pattern:$0x75316420]  ;;  %2416 = vmatmul.msk.f32.vlgmr.msrb.gmra.mxu0 %vm50_vm1, %v35_v11 }
  0x14   :  { %2419 = vmatpush.msk.msrb.mxu2 %vm54_vm0, %v150_v14  ;;  %2421 = vmatpush.msk.msrb.mxu3 %vm54_vm0, %v151_v15  ;;  %v498_v14 = vperm.slane %v2806_v53, 1 }
  0x15   :  { %2418 = vmatmul.msk.f32.vlgmr.msrb.gmra.mxu1 %vm50_vm1, %v35_v11  ;;  %2420 = vmatmul.msk.f32.vlgmr.msrb.gmra.mxu2 %vm50_vm1, %v35_v11 }
  0x16   :  { %2422 = vmatmul.msk.f32.vlgmr.msrb.gmra.mxu3 %vm50_vm1, %v35_v11 }
  0x75   :  { %v247_v20 = vpop.permute.xlu0 %246 }
  0x88   :  { %v80_v16 = vpop.f32.mrf.mxu0 }
  0x89   :  { %v100_v17 = vpop.f32.mrf.mxu1 }
  0x90   :  { %v120_v18 = vpop.f32.mrf.mxu2  ;;  %v180_v19 = vpop.f32.mrf.mxu0 }
  0x91   :  { %v140_v21 = vpop.f32.mrf.mxu3  ;;  %v181_v22 = vadd.f32 %v180_v19, %v80_v16 }
  0x92   :  { %v200_v23 = vpop.f32.mrf.mxu1 }
  0x93   :  { %v201_v24 = vadd.f32 %v200_v23, %v100_v17  ;;  %v249_v25 = vadd.f32 %v247_v20, %v181_v22  ;;  %v2449_v22 = vld [vmem:[%s3425_s6 + $0x8] sm:$0xf]  ;;  %v496_v23 = vperm.slane %v2830_v62, 1 }
  0x95   :  { %v250_v26 = vadd.f32 %v247_v20, %v201_v24  ;;  %v2698_v27 = vmax.f32 %v249_v25, 0.0  ;;  %v499_v24 = vperm.slane %v2835_v63, 1  ;;  %v3445_v25 = vperm.slane %v2830_v62, 2 }
  0x97   :  { %v2700_v28 = vmax.f32 %v250_v26, 0.0  ;;  %267 = vrot.lane.b32.xlu2 %v2698_v27, %s2598_s3 }
  0x98   :  { %v220_v29 = vpop.f32.mrf.mxu2 }
  0x99   :  { %v221_v30 = vadd.f32 %v220_v29, %v120_v18  ;;  %727 = vrot.lane.b32.xlu1 %v2700_v28, %s2599_s5  ;;  %269 = vrot.lane.b32.xlu0 %v2700_v28, %s2598_s3  ;;  %v240_v32 = vpop.f32.mrf.mxu3 }
  0x9a   :  { %v241_v34 = vadd.f32 %v240_v32, %v140_v21 }
  0x9b   :  { %v251_v31 = vadd.f32 %v247_v20, %v221_v30 }
  0x9c   :  { %v252_v35 = vadd.f32 %v247_v20, %v241_v34  ;;  %v2458_v34 = vld [vmem:[%s3425_s6 + $0xc] sm:$0xf] }
  0x9d   :  { %v2708_v33 = vmax.f32 %v251_v31, 0.0 }
  0x9e   :  { %v2716_v36 = vmax.f32 %v252_v35, 0.0  ;;  %v3446_v35 = vperm.slane %v2806_v53, 2 }
  0x9f   :  { %483 = vrot.lane.b32.xlu2 %v2700_v28, %s2600_s24 }
  0xa1   :  { %271 = vrot.lane.b32.xlu1 %v2708_v33, %s2598_s3  ;;  %605 = vrot.lane.b32.xlu0 %v2700_v28, %s2601_s25 }
  0xa7   :  { %481 = vrot.lane.b32.xlu2 %v2698_v27, %s2600_s24 }
  0xa9   :  { %273 = vrot.lane.b32.xlu1 %v2716_v36, %s2598_s3  ;;  %603 = vrot.lane.b32.xlu0 %v2698_v27, %s2601_s25 }
  0xaf   :  { %847 = vrot.lane.b32.xlu2 %v2698_v27, %s2602_s26 }
  0xb1   :  { %725 = vrot.lane.b32.xlu1 %v2698_v27, %s2599_s5  ;;  %485 = vrot.lane.b32.xlu0 %v2708_v33, %s2600_s24 }
  0xb7   :  { %609 = vrot.lane.b32.xlu2 %v2716_v36, %s2601_s25 }
  0xb9   :  { %487 = vrot.lane.b32.xlu1 %v2716_v36, %s2600_s24  ;;  %969 = vrot.lane.b32.xlu0 %v2698_v27, %s2603_s27 }
  0xbf   :  { %729 = vrot.lane.b32.xlu2 %v2708_v33, %s2599_s5 }
  0xc1   :  { %607 = vrot.lane.b32.xlu1 %v2708_v33, %s2601_s25  ;;  %731 = vrot.lane.b32.xlu0 %v2716_v36, %s2599_s5 }
  0xc7   :  { %849 = vrot.lane.b32.xlu2 %v2700_v28, %s2602_s26 }
  0xc9   :  { %1091 = vrot.lane.b32.xlu1 %v2698_v27, %s2604_s28  ;;  %851 = vrot.lane.b32.xlu0 %v2708_v33, %s2602_s26 }
  0xcf   :  { %975 = vrot.lane.b32.xlu2 %v2716_v36, %s2603_s27 }
  0xd1   :  { %853 = vrot.lane.b32.xlu1 %v2716_v36, %s2602_s26  ;;  %971 = vrot.lane.b32.xlu0 %v2700_v28, %s2603_s27 }
  0xd7   :  { %1095 = vrot.lane.b32.xlu2 %v2708_v33, %s2604_s28 }
  0xd9   :  { %973 = vrot.lane.b32.xlu1 %v2708_v33, %s2603_s27  ;;  %1097 = vrot.lane.b32.xlu0 %v2716_v36, %s2604_s28 }
  0xdf   :  { %1213 = vrot.lane.b32.xlu2 %v2698_v27, %s2605_s29 }
  0xe1   :  { %1093 = vrot.lane.b32.xlu1 %v2700_v28, %s2604_s28  ;;  %1217 = vrot.lane.b32.xlu0 %v2708_v33, %s2605_s29 }
  0xe7   :  { %1215 = vrot.lane.b32.xlu2 %v2700_v28, %s2605_s29 }
  0xe9   :  { %1219 = vrot.lane.b32.xlu1 %v2716_v36, %s2605_s29  ;;  %1338 = vperm.xlu0 %2592, %v1335_v37   ;;  %v3443_v37 = vperm.slane %v2830_v62, 3 }
  0xf1   :  { %v268_v38 = vpop.permute.xlu2 %267 }
  0xf9   :  { %v2773_v39 = vpop.permute.xlu2 %483 }
 0x101   :  { %v2775_v41 = vpop.permute.xlu2 %481 }
 0x102   :  { %v492_v50 = vsel %vm489_vm3, %v2775_v41, %v2773_v39 }
 0x103   :  { %v501_v54 = vmul.f32 %v497_v48, %v492_v50 }
 0x109   :  { %v2787_v45 = vpop.permute.xlu2 %847 }
 0x10b   :  { %v2789_v46 = vpop.permute.xlu1 %727  ;;  %v270_v47 = vpop.permute.xlu0 %269 }
 0x10c   :  { %v280_v49 = vsel %vm277_vm2, %v268_v38, %v270_v47 }
 0x10d   :  { %v288_v51 = vmul.f32 %v284_v44, %v280_v49 }
 0x10f   :  { %2426 = vmatpush.msk.msra.mxu1 %vm54_vm0, %v288_v51 }
 0x110   :  { %2427 = vmatmul.msk.f32.vlgmr.msra.gmra.mxu1 %vm50_vm1, %v282_v52 }
 0x111   :  { %2434 = vmatpush.msk.msrb.mxu1 %vm54_vm0, %v2700_v28  ;;  %v2820_v59 = vpop.permute.xlu2 %609 }
 0x113   :  { %2443 = vmatpush.msk.msra.mxu1 %vm54_vm0, %v501_v54  ;;  %v272_v56 = vpop.permute.xlu1 %271  ;;  %v2816_v57 = vpop.permute.xlu0 %605 }
 0x114   :  { %v279_v58 = vsel %vm277_vm2, %v270_v47, %v272_v56 }
 0x115   :  { %v289_v60 = vmul.f32 %v285_v55, %v279_v58 }
 0x117   :  { %2428 = vmatpush.msk.msra.mxu2 %vm54_vm0, %v289_v60 }
 0x118   :  { %2429 = vmatmul.msk.f32.vlgmr.msra.gmra.mxu2 %vm50_vm1, %v282_v52  ;;  %2435 = vmatmul.msk.f32.vlgmr.msrb.gmra.mxu1 %vm50_vm1, %v2423_v61 }
 0x119   :  { %2436 = vmatpush.msk.msrb.mxu2 %vm54_vm0, %v2708_v33  ;;  %v730_v11 = vpop.permute.xlu2 %729 }
 0x11b   :  { %v274_v3 = vpop.permute.xlu1 %273  ;;  %v604_v4 = vpop.permute.xlu0 %603 }
 0x11c   :  { %v278_v5 = vsel %vm277_vm2, %v272_v56, %v274_v3  ;;  %v281_v6 = vsel %vm277_vm2, %v274_v3, %v268_v38  ;;  %v614_v7 = vsel %vm611_vm4, %v604_v4, %v2816_v57  ;;  %v615_v28 = vsel %vm611_vm4, %v2820_v59, %v604_v4 }
 0x11d   :  { %v287_v8 = vmul.f32 %v283_v0, %v281_v6  ;;  %v290_v9 = vmul.f32 %v286_v1, %v278_v5  ;;  %v623_v10 = vmul.f32 %v619_v2, %v614_v7  ;;  %v622_v33 = vmul.f32 %v3445_v25, %v615_v28 }
 0x11e   :  { %v735_v56 = vsel %vm733_vm5, %v2789_v46, %v730_v11  ;;  %v3438_v4 = vperm.slane %v2782_v43, 5 }
 0x11f   :  { %2424 = vmatpush.msk.msra.mxu0 %vm54_vm0, %v287_v8  ;;  %2430 = vmatpush.msk.msra.mxu3 %vm54_vm0, %v290_v9 }
 0x120   :  { %2452 = vmatpush.msk.msrb.mxu1 %vm54_vm0, %v623_v10  ;;  %2425 = vmatmul.msk.f32.vlgmr.msra.gmra.mxu0 %vm50_vm1, %v282_v52  ;;  %v2467_v10 = vld [vmem:[%s3425_s6 + $0x14] sm:$0xf] }
 0x121   :  { %2431 = vmatmul.msk.f32.vlgmr.msra.gmra.mxu3 %vm50_vm1, %v282_v52  ;;  %2432 = vmatpush.msk.msrb.mxu0 %vm54_vm0, %v2698_v27  ;;  %v850_v21 = vpop.permute.xlu2 %849 }
 0x122   :  { %2437 = vmatmul.msk.f32.vlgmr.msrb.gmra.mxu2 %vm50_vm1, %v2423_v61  ;;  %2438 = vmatpush.msk.msrb.mxu3 %vm54_vm0, %v2716_v36  ;;  %v3444_v36 = vperm.slane %v2835_v63, 2 }
 0x123   :  { %2444 = vmatmul.msk.f32.vlgmr.msra.gmra.mxu1 %vm50_vm1, %v2440_v12  ;;  %v726_v15 = vpop.permute.xlu1 %725  ;;  %v486_v16 = vpop.permute.xlu0 %485 }
 0x124   :  { %v736_v17 = vsel %vm733_vm5, %v726_v15, %v2789_v46  ;;  %v491_v18 = vsel %vm489_vm3, %v2773_v39, %v486_v16  ;;  %v3440_v39 = vperm.slane %v2835_v63, 3  ;;  %v746_v46 = vmul.f32 %v3441_v40, %v735_v56 }
 0x125   :  { %v745_v19 = vmul.f32 %v741_v13, %v736_v17  ;;  %v502_v20 = vmul.f32 %v498_v14, %v491_v18  ;;  %v3434_v18 = vperm.slane %v2835_v63, 6 }
 0x127   :  { %2445 = vmatpush.msk.msra.mxu2 %vm54_vm0, %v502_v20  ;;  %2461 = vmatpush.msk.msra.mxu1 %vm54_vm0, %v745_v19 }
 0x128   :  { %2433 = vmatmul.msk.f32.vlgmr.msrb.gmra.mxu0 %vm50_vm1, %v2423_v61 }
 0x129   :  { %2439 = vmatmul.msk.f32.vlgmr.msrb.gmra.mxu3 %vm50_vm1, %v2423_v61  ;;  %v2925_v38 = vpop.permute.xlu2 %975 }
 0x12a   :  { %2446 = vmatmul.msk.f32.vlgmr.msra.gmra.mxu2 %vm50_vm1, %v2440_v12 }
 0x12b   :  { %2453 = vmatmul.msk.f32.vlgmr.msrb.gmra.mxu1 %vm50_vm1, %v2449_v22  ;;  %v488_v26 = vpop.permute.xlu1 %487  ;;  %v2898_v27 = vpop.permute.xlu0 %969 }
 0x12c   :  { %v490_v29 = vsel %vm489_vm3, %v486_v16, %v488_v26  ;;  %v493_v30 = vsel %vm489_vm3, %v488_v26, %v2775_v41  ;;  %v3442_v41 = vperm.slane %v2830_v62, 5 }
 0x12d   :  { %v500_v31 = vmul.f32 %v496_v23, %v493_v30  ;;  %v503_v32 = vmul.f32 %v499_v24, %v490_v29 }
 0x12f   :  { %2441 = vmatpush.msk.msra.mxu0 %vm54_vm0, %v500_v31  ;;  %2447 = vmatpush.msk.msra.mxu3 %vm54_vm0, %v503_v32  ;;  %v3435_v31 = vperm.slane %v2806_v53, 6  ;;  %v3431_v32 = vperm.slane %v2835_v63, 7 }
 0x130   :  { %2442 = vmatmul.msk.f32.vlgmr.msra.gmra.mxu0 %vm50_vm1, %v2440_v12 }
 0x131   :  { %2448 = vmatmul.msk.f32.vlgmr.msra.gmra.mxu3 %vm50_vm1, %v2440_v12  ;;  %2450 = vmatpush.msk.msrb.mxu0 %vm54_vm0, %v622_v33  ;;  %v2972_v7 = vpop.permute.xlu2 %1095  ;;  %v3439_v12 = vperm.slane %v2835_v63, 5  ;;  %v3432_v33 = vperm.slane %v2806_v53, 7 }
 0x133   :  { %2462 = vmatmul.msk.f32.vlgmr.msra.gmra.mxu1 %vm50_vm1, %v2458_v34  ;;  %v608_v47 = vpop.permute.xlu1 %607  ;;  %v732_v49 = vpop.permute.xlu0 %731 }
 0x134   :  { %v612_v50 = vsel %vm611_vm4, %v608_v47, %v2820_v59  ;;  %v613_v51 = vsel %vm611_vm4, %v2816_v57, %v608_v47  ;;  %v734_v52 = vsel %vm733_vm5, %v730_v11, %v732_v49  ;;  %v737_v54 = vsel %vm733_vm5, %v732_v49, %v726_v15 }
 0x135   :  { %v624_v58 = vmul.f32 %v3446_v35, %v613_v51  ;;  %v625_v59 = vmul.f32 %v3444_v36, %v612_v50  ;;  %v744_v60 = vmul.f32 %v3443_v37, %v737_v54  ;;  %v858_v57 = vsel %vm855_vm6, %v2787_v45, %v850_v21 }
 0x136   :  { %v747_v61 = vmul.f32 %v3440_v39, %v734_v52  ;;  %v866_v3 = vmul.f32 %v3442_v41, %v858_v57  ;;  %v3437_v11 = vperm.slane %v2806_v53, 5  ;;  %v3436_v15 = vperm.slane %v2830_v62, 6 }
 0x137   :  { %2454 = vmatpush.msk.msrb.mxu2 %vm54_vm0, %v624_v58  ;;  %2456 = vmatpush.msk.msrb.mxu3 %vm54_vm0, %v625_v59  ;;  %v2476_v58 = vld [vmem:[%s3425_s6 + $0x18] sm:$0xf]  ;;  %v3430_v57 = vperm.slane %v2830_v62, 7 }
 0x138   :  { %2459 = vmatpush.msk.msra.mxu0 %vm54_vm0, %v744_v60  ;;  %2455 = vmatmul.msk.f32.vlgmr.msrb.gmra.mxu2 %vm50_vm1, %v2449_v22 }
 0x139   :  { %2451 = vmatmul.msk.f32.vlgmr.msrb.gmra.mxu0 %vm50_vm1, %v2449_v22  ;;  %2457 = vmatmul.msk.f32.vlgmr.msrb.gmra.mxu3 %vm50_vm1, %v2449_v22  ;;  %v981_v22 = vsel %vm977_vm7, %v2925_v38, %v2898_v27  ;;  %v3009_v30 = vpop.permute.xlu2 %1213 }
 0x13a   :  { %2463 = vmatpush.msk.msra.mxu2 %vm54_vm0, %v746_v46  ;;  %2465 = vmatpush.msk.msra.mxu3 %vm54_vm0, %v747_v61  ;;  %v3429_v61 = vperm.slane %v2782_v43, 7  ;;  %v3059_v46 = vld [vmem:[%s3423_s2 + $0x20] ss:$0 sm:$0xff] }
 0x13b   :  { %2468 = vmatpush.msk.msrb.mxu0 %vm54_vm0, %v866_v3  ;;  %v2970_v5 = vpop.permute.xlu1 %1091  ;;  %v852_v6 = vpop.permute.xlu0 %851  ;;  %v3066_v3 = vld [vmem:[%s3423_s2 + $0x28] ss:$0 sm:$0xff] }
 0x13c   :  { %v857_v8 = vsel %vm855_vm6, %v850_v21, %v852_v6 }
 0x13d   :  { %v867_v9 = vmul.f32 %v3438_v4, %v857_v8 }
 0x13f   :  { %2470 = vmatpush.msk.msrb.mxu1 %vm54_vm0, %v867_v9 }
 0x140   :  { %2464 = vmatmul.msk.f32.vlgmr.msra.gmra.mxu2 %vm50_vm1, %v2458_v34  ;;  %2471 = vmatmul.msk.f32.vlgmr.msrb.gmra.mxu1 %vm50_vm1, %v2467_v10 }
 0x141   :  { %2460 = vmatmul.msk.f32.vlgmr.msra.gmra.mxu0 %vm50_vm1, %v2458_v34  ;;  %2466 = vmatmul.msk.f32.vlgmr.msra.gmra.mxu3 %vm50_vm1, %v2458_v34  ;;  %v1216_v60 = vpop.permute.xlu2 %1215 }
 0x143   :  { %v854_v16 = vpop.permute.xlu1 %853  ;;  %v972_v17 = vpop.permute.xlu0 %971 }
 0x144   :  { %v856_v19 = vsel %vm855_vm6, %v852_v6, %v854_v16  ;;  %v859_v20 = vsel %vm855_vm6, %v854_v16, %v2787_v45  ;;  %v980_v21 = vsel %vm977_vm7, %v2898_v27, %v972_v17  ;;  %v991_v45 = vmul.f32 %v3434_v18, %v981_v22 }
 0x145   :  { %v868_v26 = vmul.f32 %v3437_v11, %v856_v19  ;;  %v869_v28 = vmul.f32 %v3439_v12, %v859_v20  ;;  %v988_v29 = vmul.f32 %v3436_v15, %v980_v21  ;;  %v3433_v27 = vperm.slane %v2782_v43, 6  ;;  %v2485_v21 = vld [vmem:[%s3425_s6 + $0x1c] sm:$0xf] }
 0x146   :  { %v1224_v6 = vsel %vm1221_vm9, %v3009_v30, %v1216_v60 }
 0x147   :  { %2472 = vmatpush.msk.msrb.mxu2 %vm54_vm0, %v868_v26  ;;  %2474 = vmatpush.msk.msrb.mxu3 %vm54_vm0, %v869_v28  ;;  %v1232_v22 = vmul.f32 %v3059_v46, %v1224_v6  ;;  %v3102_v26 = vld [vmem:[%s3423_s2 + $0x38] ss:$0 sm:$0xff] }
 0x148   :  { %2477 = vmatpush.msk.msra.mxu0 %vm54_vm0, %v988_v29  ;;  %2473 = vmatmul.msk.f32.vlgmr.msrb.gmra.mxu2 %vm50_vm1, %v2467_v10 }
 0x149   :  { %2469 = vmatmul.msk.f32.vlgmr.msrb.gmra.mxu0 %vm50_vm1, %v2467_v10  ;;  %2475 = vmatmul.msk.f32.vlgmr.msrb.gmra.mxu3 %vm50_vm1, %v2467_v10 }
 0x14a   :  { %2483 = vmatpush.msk.msra.mxu3 %vm54_vm0, %v991_v45 }
 0x14b   :  { %v974_v34 = vpop.permute.xlu1 %973  ;;  %v1098_v47 = vpop.permute.xlu0 %1097 }
 0x14c   :  { %v978_v49 = vsel %vm977_vm7, %v974_v34, %v2925_v38  ;;  %v979_v50 = vsel %vm977_vm7, %v972_v17, %v974_v34  ;;  %v1100_v51 = vsel %vm1099_vm8, %v2972_v7, %v1098_v47  ;;  %v1103_v52 = vsel %vm1099_vm8, %v1098_v47, %v2970_v5 }
 0x14d   :  { %v989_v54 = vmul.f32 %v3433_v27, %v979_v50  ;;  %v990_v56 = vmul.f32 %v3435_v31, %v978_v49  ;;  %v1113_v38 = vmul.f32 %v3431_v32, %v1103_v52  ;;  %v1112_v59 = vmul.f32 %v3432_v33, %v1100_v51  ;;  %v2494_v49 = vld [vmem:[%s3425_s6 + $0x20] sm:$0xf] }
 0x14f   :  { %2479 = vmatpush.msk.msra.mxu1 %vm54_vm0, %v989_v54  ;;  %2481 = vmatpush.msk.msra.mxu2 %vm54_vm0, %v990_v56 }
 0x150   :  { %2492 = vmatpush.msk.msrb.mxu3 %vm54_vm0, %v1113_v38  ;;  %2480 = vmatmul.msk.f32.vlgmr.msra.gmra.mxu1 %vm50_vm1, %v2476_v58 }
 0x151   :  { %2478 = vmatmul.msk.f32.vlgmr.msra.gmra.mxu0 %vm50_vm1, %v2476_v58  ;;  %2482 = vmatmul.msk.f32.vlgmr.msra.gmra.mxu2 %vm50_vm1, %v2476_v58 }
 0x152   :  { %2484 = vmatmul.msk.f32.vlgmr.msra.gmra.mxu3 %vm50_vm1, %v2476_v58  ;;  %2490 = vmatpush.msk.msrb.mxu2 %vm54_vm0, %v1112_v59 }
 0x153   :  { %v1094_v8 = vpop.permute.xlu1 %1093  ;;  %v1218_v9 = vpop.permute.xlu0 %1217 }
 0x154   :  { %v1101_v10 = vsel %vm1099_vm8, %v1094_v8, %v2972_v7  ;;  %v1102_v16 = vsel %vm1099_vm8, %v2970_v5, %v1094_v8  ;;  %v1223_v17 = vsel %vm1221_vm9, %v1216_v60, %v1218_v9  ;;  %v3097_v5 = vld [vmem:[%s3423_s2 + $0x30] ss:$0 sm:$0xff] }
 0x155   :  { %v1110_v19 = vmul.f32 %v3430_v57, %v1102_v16  ;;  %v1111_v20 = vmul.f32 %v3429_v61, %v1101_v10  ;;  %v1233_v7 = vmul.f32 %v3066_v3, %v1223_v17 }
 0x157   :  { %2486 = vmatpush.msk.msrb.mxu0 %vm54_vm0, %v1110_v19  ;;  %2488 = vmatpush.msk.msrb.mxu1 %vm54_vm0, %v1111_v20 }
 0x158   :  { %2489 = vmatmul.msk.f32.vlgmr.msrb.gmra.mxu1 %vm50_vm1, %v2485_v21 }
 0x159   :  { %2495 = vmatpush.msk.msra.mxu0 %vm54_vm0, %v1232_v22  ;;  %2491 = vmatmul.msk.f32.vlgmr.msrb.gmra.mxu2 %vm50_vm1, %v2485_v21 }
 0x15a   :  { %2487 = vmatmul.msk.f32.vlgmr.msrb.gmra.mxu0 %vm50_vm1, %v2485_v21  ;;  %2493 = vmatmul.msk.f32.vlgmr.msrb.gmra.mxu3 %vm50_vm1, %v2485_v21 }
 0x15b   :  { %2497 = vmatpush.msk.msra.mxu1 %vm54_vm0, %v1233_v7  ;;  %v1220_v28 = vpop.permute.xlu1 %1219 }
 0x15c   :  { %v1222_v29 = vsel %vm1221_vm9, %v1218_v9, %v1220_v28  ;;  %v1225_v45 = vsel %vm1221_vm9, %v1220_v28, %v3009_v30 }
 0x15d   :  { %v1234_v34 = vmul.f32 %v3097_v5, %v1222_v29  ;;  %v1235_v47 = vmul.f32 %v3102_v26, %v1225_v45 }
 0x15f   :  { %2499 = vmatpush.msk.msra.mxu2 %vm54_vm0, %v1234_v34  ;;  %2501 = vmatpush.msk.msra.mxu3 %vm54_vm0, %v1235_v47 }
 0x160   :  { %2498 = vmatmul.msk.f32.vlgmr.msra.gmra.mxu1 %vm50_vm1, %v2494_v49 }
 0x161   :  { %2500 = vmatmul.msk.f32.vlgmr.msra.gmra.mxu2 %vm50_vm1, %v2494_v49 }
 0x162   :  { %2496 = vmatmul.msk.f32.vlgmr.msra.gmra.mxu0 %vm50_vm1, %v2494_v49  ;;  %2502 = vmatmul.msk.f32.vlgmr.msra.gmra.mxu3 %vm50_vm1, %v2494_v49 }
 0x18d   :  { %v343_v30 = vpop.f32.mrf.mxu1 }
 0x195   :  { %v438_v51 = vpop.f32.mrf.mxu1 }
 0x196   :  { %v439_v45 = vadd.f32 %v438_v51, %v343_v30 }
 0x19b   :  { %v363_v52 = vpop.f32.mrf.mxu2 }
 0x19d   :  { %v323_v50 = vpop.f32.mrf.mxu0 }
 0x1a0   :  { %v556_v38 = vpop.f32.mrf.mxu1 }
 0x1a1   :  { %v600_v61 = vadd.f32 %v556_v38, %v439_v45 }
 0x1a4   :  { %v383_v54 = vpop.f32.mrf.mxu3 }
 0x1a5   :  { %v418_v56 = vpop.f32.mrf.mxu0  ;;  %v458_v58 = vpop.f32.mrf.mxu2 }
 0x1a6   :  { %v419_v57 = vadd.f32 %v418_v56, %v323_v50  ;;  %v459_v39 = vadd.f32 %v458_v58, %v363_v52 }
 0x1a8   :  { %v678_v6 = vpop.f32.mrf.mxu1 }
 0x1a9   :  { %v722_v33 = vadd.f32 %v678_v6, %v600_v61  ;;  %v1339_v6 = vpop.permute.xlu0 %1338 }
 0x1ac   :  { %v478_v59 = vpop.f32.mrf.mxu3 }
 0x1ad   :  { %v536_v60 = vpop.f32.mrf.mxu0  ;;  %v576_v8 = vpop.f32.mrf.mxu2  ;;  %v479_v27 = vadd.f32 %v478_v59, %v383_v54 }
 0x1ae   :  { %v599_v32 = vadd.f32 %v536_v60, %v419_v57  ;;  %v601_v36 = vadd.f32 %v576_v8, %v459_v39 }
 0x1b0   :  { %v800_v19 = vpop.f32.mrf.mxu1 }
 0x1b1   :  { %v844_v4 = vadd.f32 %v800_v19, %v722_v33 }
 0x1b4   :  { %v596_v9 = vpop.f32.mrf.mxu3 }
 0x1b5   :  { %v602_v41 = vadd.f32 %v596_v9, %v479_v27 }
 0x1b6   :  { %v658_v10 = vpop.f32.mrf.mxu0 }
 0x1b7   :  { %v721_v31 = vadd.f32 %v658_v10, %v599_v32 }
 0x1bb   :  { %v698_v16 = vpop.f32.mrf.mxu2 }
 0x1bc   :  { %v718_v17 = vpop.f32.mrf.mxu3  ;;  %v723_v25 = vadd.f32 %v698_v16, %v601_v36 }
 0x1bd   :  { %v922_v7 = vpop.f32.mrf.mxu1  ;;  %v724_v38 = vadd.f32 %v718_v17, %v602_v41 }
 0x1be   :  { %v780_v20 = vpop.f32.mrf.mxu0  ;;  %v966_v37 = vadd.f32 %v922_v7, %v844_v4 }
 0x1bf   :  { %v843_v40 = vadd.f32 %v780_v20, %v721_v31 }
 0x1c3   :  { %v820_v21 = vpop.f32.mrf.mxu2 }
 0x1c4   :  { %v840_v22 = vpop.f32.mrf.mxu3  ;;  %v845_v61 = vadd.f32 %v820_v21, %v723_v25 }
 0x1c5   :  { %v846_v59 = vadd.f32 %v840_v22, %v724_v38 }
 0x1c6   :  { %v902_v28 = vpop.f32.mrf.mxu0 }
 0x1c7   :  { %v965_v30 = vadd.f32 %v902_v28, %v843_v40 }
 0x1cb   :  { %v942_v29 = vpop.f32.mrf.mxu2 }
 0x1cc   :  { %v962_v34 = vpop.f32.mrf.mxu3  ;;  %v967_v52 = vadd.f32 %v942_v29, %v845_v61 }
 0x1cd   :  { %v1044_v47 = vpop.f32.mrf.mxu1  ;;  %v968_v27 = vadd.f32 %v962_v34, %v846_v59 }
 0x1ce   :  { %v1024_v49 = vpop.f32.mrf.mxu0  ;;  %v1088_v51 = vadd.f32 %v1044_v47, %v966_v37  ;;  %v1363_v47 = vld [vmem:[%s3427_s8] sm:$0xf] }
 0x1cf   :  { %v1087_v35 = vadd.f32 %v1024_v49, %v965_v30 }
 0x1d4   :  { %v1064_v18 = vpop.f32.mrf.mxu2 }
 0x1d5   :  { %v1084_v15 = vpop.f32.mrf.mxu3  ;;  %v1166_v11 = vpop.f32.mrf.mxu1  ;;  %v1089_v39 = vadd.f32 %v1064_v18, %v967_v52 }
 0x1d6   :  { %v1210_v50 = vadd.f32 %v1166_v11, %v1088_v51  ;;  %v1090_v37 = vadd.f32 %v1084_v15, %v968_v27  ;;  %v2377_v15 = vld [vmem:[%s3426_s9] sm:$0xf] }
 0x1d7   :  { %v1146_v12 = vpop.f32.mrf.mxu0 }
 0x1d8   :  { %v1209_v54 = vadd.f32 %v1146_v12, %v1087_v35 }
 0x1dc   :  { %v1186_v57 = vpop.f32.mrf.mxu2 }
 0x1dd   :  { %v1206_v56 = vpop.f32.mrf.mxu3  ;;  %v1288_v32 = vpop.f32.mrf.mxu1  ;;  %v1211_v58 = vadd.f32 %v1186_v57, %v1089_v39  ;;  %v2503_v57 = vld [vmem:[%s3427_s8 + $0x10] sm:$0xf] }
 0x1de   :  { %v1332_v33 = vadd.f32 %v1288_v32, %v1210_v50  ;;  %v1212_v11 = vadd.f32 %v1206_v56, %v1090_v37 }
 0x1df   :  { %v1268_v60 = vpop.f32.mrf.mxu0 }
 0x1e0   :  { %v1331_v31 = vadd.f32 %v1268_v60, %v1209_v54  ;;  %v1342_v4 = vadd.f32 %v1339_v6, %v1332_v33 }
 0x1e2   :  { %v1341_v40 = vadd.f32 %v1339_v6, %v1331_v31  ;;  %v1346_v36 = vmax.f32 %v1342_v4, 0.0 }
 0x1e4   :  { %v1345_v41 = vmax.f32 %v1341_v40, 0.0  ;;  %v1308_v8 = vpop.f32.mrf.mxu2  ;;  %1353 = vrot.lane.b32.xlu0 %v1346_v36, %s2598_s3  ;;  %v2529_v40 = vld [vmem:[%s3427_s8 + $0x8] sm:$0xf] }
 0x1e5   :  { %v1333_v25 = vadd.f32 %v1308_v8, %v1211_v58  ;;  %v1328_v35 = vpop.f32.mrf.mxu3 }
 0x1e6   :  { %1558 = vrot.lane.b32.xlu2 %v1345_v41, %s2600_s24  ;;  %1351 = vrot.lane.b32.xlu1 %v1345_v41, %s2598_s3  ;;  %v1334_v12 = vadd.f32 %v1328_v35, %v1212_v11  ;;  %v3447_v11 = vperm.slane %v2806_v53, 2  ;;  %v3448_v35 = vperm.slane %v2830_v62, 2 }
 0x1e7   :  { %v1343_v9 = vadd.f32 %v1339_v6, %v1333_v25 }
 0x1e8   :  { %v1344_v10 = vadd.f32 %v1339_v6, %v1334_v12  ;;  %v2520_v6 = vld [vmem:[%s3427_s8 + $0x4] sm:$0xf] }
 0x1e9   :  { %v3125_v16 = vmax.f32 %v1343_v9, 0.0  ;;  %v3449_v9 = vperm.slane %v2835_v63, 2 }
 0x1ea   :  { %v3127_v18 = vmax.f32 %v1344_v10, 0.0 }
 0x1ec   :  { %1675 = vrot.lane.b32.xlu0 %v1345_v41, %s2601_s25 }
 0x1ee   :  { %1357 = vrot.lane.b32.xlu2 %v3127_v18, %s2598_s3  ;;  %1355 = vrot.lane.b32.xlu1 %v3125_v16, %s2598_s3 }
 0x1f4   :  { %1794 = vrot.lane.b32.xlu0 %v1346_v36, %s2599_s5 }
 0x1f6   :  { %1677 = vrot.lane.b32.xlu2 %v1346_v36, %s2601_s25  ;;  %1560 = vrot.lane.b32.xlu1 %v1346_v36, %s2600_s24 }
 0x1fc   :  { %1564 = vrot.lane.b32.xlu0 %v3127_v18, %s2600_s24 }
 0x1fe   :  { %1562 = vrot.lane.b32.xlu2 %v3125_v16, %s2600_s24  ;;  %1792 = vrot.lane.b32.xlu1 %v1345_v41, %s2599_s5 }
 0x204   :  { %1679 = vrot.lane.b32.xlu0 %v3125_v16, %s2601_s25 }
 0x206   :  { %1909 = vrot.lane.b32.xlu2 %v1345_v41, %s2602_s26  ;;  %1681 = vrot.lane.b32.xlu1 %v3127_v18, %s2601_s25 }
 0x20c   :  { %2026 = vrot.lane.b32.xlu0 %v1345_v41, %s2603_s27 }
 0x20e   :  { %1798 = vrot.lane.b32.xlu2 %v3127_v18, %s2599_s5  ;;  %1796 = vrot.lane.b32.xlu1 %v3125_v16, %s2599_s5 }
 0x214   :  { %1915 = vrot.lane.b32.xlu0 %v3127_v18, %s2602_s26 }
 0x216   :  { %1911 = vrot.lane.b32.xlu2 %v1346_v36, %s2602_s26  ;;  %1913 = vrot.lane.b32.xlu1 %v3125_v16, %s2602_s26 }
 0x21c   :  { %2028 = vrot.lane.b32.xlu0 %v1346_v36, %s2603_s27 }
 0x21e   :  { %2030 = vrot.lane.b32.xlu2 %v3125_v16, %s2603_s27  ;;  %2032 = vrot.lane.b32.xlu1 %v3127_v18, %s2603_s27 }
 0x224   :  { %2147 = vrot.lane.b32.xlu0 %v3125_v16, %s2604_s28 }
 0x226   :  { %2149 = vrot.lane.b32.xlu2 %v3127_v18, %s2604_s28  ;;  %2143 = vrot.lane.b32.xlu1 %v1345_v41, %s2604_s28 }
 0x22c   :  { %2266 = vrot.lane.b32.xlu0 %v3127_v18, %s2605_s29 }
 0x22e   :  { %2260 = vrot.lane.b32.xlu2 %v1345_v41, %s2605_s29  ;;  %2145 = vrot.lane.b32.xlu1 %v1346_v36, %s2604_s28 }
 0x234   :  { %2380 = vperm.xlu0 %2592, %v2377_v15   ;;  %v2538_v15 = vld [vmem:[%s3427_s8 + $0xc] sm:$0xf] }
 0x236   :  { %2262 = vrot.lane.b32.xlu2 %v1346_v36, %s2605_s29  ;;  %2264 = vrot.lane.b32.xlu1 %v3125_v16, %s2605_s29 }
 0x240   :  { %v1559_v17 = vpop.permute.xlu2 %1558 }
 0x248   :  { %v1358_v19 = vpop.permute.xlu2 %1357 }
 0x250   :  { %v3177_v20 = vpop.permute.xlu2 %1677 }
 0x256   :  { %v1354_v21 = vpop.permute.xlu0 %1353 }
 0x258   :  { %v1352_v22 = vpop.permute.xlu1 %1351  ;;  %v1563_v7 = vpop.permute.xlu2 %1562 }
 0x259   :  { %v1362_v28 = vsel %vm277_vm2, %v1358_v19, %v1352_v22  ;;  %v1361_v29 = vsel %vm277_vm2, %v1352_v22, %v1354_v21 }
 0x25a   :  { %v1364_v45 = vmul.f32 %v1362_v28, %v283_v0  ;;  %v1365_v34 = vmul.f32 %v1361_v29, %v284_v44  ;;  %v3452_v29 = vperm.slane %v2806_v53, 3 }
 0x25c   :  { %2504 = vmatpush.msk.msrb.mxu0 %vm54_vm0, %v1364_v45  ;;  %2506 = vmatpush.msk.msrb.mxu1 %vm54_vm0, %v1365_v34  ;;  %v3453_v34 = vperm.slane %v2835_v63, 3 }
 0x25d   :  { %2507 = vmatmul.msk.f32.vlgmr.msrb.gmra.mxu1 %vm50_vm1, %v1363_v47  ;;  %2505 = vmatmul.msk.f32.vlgmr.msrb.gmra.mxu0 %vm50_vm1, %v1363_v47 }
 0x25e   :  { %2512 = vmatpush.msk.msra.mxu0 %vm54_vm0, %v1345_v41  ;;  %2514 = vmatpush.msk.msra.mxu1 %vm54_vm0, %v1346_v36  ;;  %v1676_v0 = vpop.permute.xlu0 %1675 }
 0x25f   :  { %v1685_v61 = vsel %vm611_vm4, %v1676_v0, %v3177_v20 }
 0x260   :  { %v1356_v49 = vpop.permute.xlu1 %1355  ;;  %v3204_v50 = vpop.permute.xlu2 %1909  ;;  %v1690_v60 = vmul.f32 %v1685_v61, %v619_v2 }
 0x261   :  { %v1359_v44 = vsel %vm277_vm2, %v1356_v49, %v1358_v19  ;;  %v1360_v30 = vsel %vm277_vm2, %v1354_v21, %v1356_v49 }
 0x262   :  { %v1366_v51 = vmul.f32 %v1360_v30, %v285_v55  ;;  %v1367_v38 = vmul.f32 %v1359_v44, %v286_v1 }
 0x264   :  { %2508 = vmatpush.msk.msrb.mxu2 %vm54_vm0, %v1366_v51  ;;  %2510 = vmatpush.msk.msrb.mxu3 %vm54_vm0, %v1367_v38  ;;  %v3454_v38 = vperm.slane %v2835_v63, 5 }
 0x265   :  { %2509 = vmatmul.msk.f32.vlgmr.msrb.gmra.mxu2 %vm50_vm1, %v1363_v47  ;;  %2511 = vmatmul.msk.f32.vlgmr.msrb.gmra.mxu3 %vm50_vm1, %v1363_v47 }
 0x266   :  { %2516 = vmatpush.msk.msra.mxu2 %vm54_vm0, %v3125_v16  ;;  %2518 = vmatpush.msk.msra.mxu3 %vm54_vm0, %v3127_v18  ;;  %v1795_v55 = vpop.permute.xlu0 %1794  ;;  %v3450_v16 = vperm.slane %v2830_v62, 3 }
 0x267   :  { %2515 = vmatmul.msk.f32.vlgmr.msra.gmra.mxu1 %vm50_vm1, %v2503_v57  ;;  %2513 = vmatmul.msk.f32.vlgmr.msra.gmra.mxu0 %vm50_vm1, %v2503_v57 }
 0x268   :  { %v1561_v1 = vpop.permute.xlu1 %1560  ;;  %v1799_v33 = vpop.permute.xlu2 %1798 }
 0x269   :  { %v1567_v54 = vsel %vm489_vm3, %v1561_v1, %v1563_v7  ;;  %v1568_v56 = vsel %vm489_vm3, %v1559_v17, %v1561_v1  ;;  %v3455_v1 = vperm.slane %v2782_v43, 5 }
 0x26a   :  { %v1573_v32 = vmul.f32 %v1568_v56, %v497_v48  ;;  %v1574_v59 = vmul.f32 %v1567_v54, %v498_v14  ;;  %v3456_v54 = vperm.slane %v2806_v53, 5 }
 0x26c   :  { %2523 = vmatpush.msk.msrb.mxu1 %vm54_vm0, %v1573_v32  ;;  %2525 = vmatpush.msk.msrb.mxu2 %vm54_vm0, %v1574_v59 }
 0x26d   :  { %2517 = vmatmul.msk.f32.vlgmr.msra.gmra.mxu2 %vm50_vm1, %v2503_v57  ;;  %2519 = vmatmul.msk.f32.vlgmr.msra.gmra.mxu3 %vm50_vm1, %v2503_v57 }
 0x26e   :  { %2532 = vmatpush.msk.msra.mxu1 %vm54_vm0, %v1690_v60  ;;  %v1565_v48 = vpop.permute.xlu0 %1564 }
 0x26f   :  { %2524 = vmatmul.msk.f32.vlgmr.msrb.gmra.mxu1 %vm50_vm1, %v2520_v6  ;;  %v1566_v2 = vsel %vm489_vm3, %v1563_v7, %v1565_v48  ;;  %v1569_v52 = vsel %vm489_vm3, %v1565_v48, %v1559_v17  ;;  %v3451_v17 = vperm.slane %v2830_v62, 5 }
 0x270   :  { %v1793_v14 = vpop.permute.xlu1 %1792  ;;  %v1572_v27 = vmul.f32 %v1569_v52, %v496_v23  ;;  %v1575_v39 = vmul.f32 %v1566_v2, %v499_v24  ;;  %v1912_v23 = vpop.permute.xlu2 %1911  ;;  %v3458_v52 = vperm.slane %v2806_v53, 6 }
 0x271   :  { %v1802_v31 = vsel %vm733_vm5, %v1793_v14, %v1795_v55  ;;  %v1803_v36 = vsel %vm733_vm5, %v1799_v33, %v1793_v14  ;;  %v1919_v25 = vsel %vm855_vm6, %v3204_v50, %v1912_v23  ;;  %v3457_v14 = vperm.slane %v2830_v62, 6 }
 0x272   :  { %v1807_v4 = vmul.f32 %v1802_v31, %v741_v13  ;;  %2521 = vmatpush.msk.msrb.mxu0 %vm54_vm0, %v1572_v27  ;;  %2527 = vmatpush.msk.msrb.mxu3 %vm54_vm0, %v1575_v39  ;;  %v1806_v18 = vmul.f32 %v1803_v36, %v3450_v16  ;;  %v1923_v19 = vmul.f32 %v1919_v25, %v3451_v17  ;;  %v3459_v27 = vperm.slane %v2835_v63, 6 }
 0x273   :  { %2522 = vmatmul.msk.f32.vlgmr.msrb.gmra.mxu0 %vm50_vm1, %v2520_v6  ;;  %v3460_v39 = vperm.slane %v2782_v43, 6  ;;  %v3463_v17 = vperm.slane %v2830_v62, 7 }
 0x274   :  { %2541 = vmatpush.msk.msrb.mxu1 %vm54_vm0, %v1807_v4 }
 0x275   :  { %2526 = vmatmul.msk.f32.vlgmr.msrb.gmra.mxu2 %vm50_vm1, %v2520_v6  ;;  %2528 = vmatmul.msk.f32.vlgmr.msrb.gmra.mxu3 %vm50_vm1, %v2520_v6 }
 0x276   :  { %v1680_v13 = vpop.permute.xlu0 %1679 }
 0x277   :  { %2533 = vmatmul.msk.f32.vlgmr.msra.gmra.mxu1 %vm50_vm1, %v2529_v40  ;;  %v1684_v37 = vsel %vm611_vm4, %v3177_v20, %v1680_v13 }
 0x278   :  { %v1682_v24 = vpop.permute.xlu1 %1681  ;;  %v1691_v8 = vmul.f32 %v1684_v37, %v3447_v11  ;;  %v2031_v21 = vpop.permute.xlu2 %2030 }
 0x279   :  { %v1686_v58 = vsel %vm611_vm4, %v1682_v24, %v1676_v0  ;;  %v1683_v41 = vsel %vm611_vm4, %v1680_v13, %v1682_v24 }
 0x27a   :  { %v1689_v12 = vmul.f32 %v1686_v58, %v3448_v35  ;;  %v1692_v10 = vmul.f32 %v1683_v41, %v3449_v9  ;;  %2534 = vmatpush.msk.msra.mxu2 %vm54_vm0, %v1691_v8  ;;  %v3461_v41 = vperm.slane %v2806_v53, 7  ;;  %v3462_v8 = vperm.slane %v2835_v63, 7  ;;  %v2565_v35 = vld [vmem:[%s3427_s8 + $0x1c] sm:$0xf] }
 0x27c   :  { %2530 = vmatpush.msk.msra.mxu0 %vm54_vm0, %v1689_v12  ;;  %2536 = vmatpush.msk.msra.mxu3 %vm54_vm0, %v1692_v10 }
 0x27d   :  { %2531 = vmatmul.msk.f32.vlgmr.msra.gmra.mxu0 %vm50_vm1, %v2529_v40  ;;  %2535 = vmatmul.msk.f32.vlgmr.msra.gmra.mxu2 %vm50_vm1, %v2529_v40 }
 0x27e   :  { %2537 = vmatmul.msk.f32.vlgmr.msra.gmra.mxu3 %vm50_vm1, %v2529_v40  ;;  %2539 = vmatpush.msk.msrb.mxu0 %vm54_vm0, %v1806_v18  ;;  %v2027_v20 = vpop.permute.xlu0 %2026 }
 0x27f   :  { %2542 = vmatmul.msk.f32.vlgmr.msrb.gmra.mxu1 %vm50_vm1, %v2538_v15 }
 0x280   :  { %2548 = vmatpush.msk.msra.mxu0 %vm54_vm0, %v1923_v19  ;;  %v1797_v22 = vpop.permute.xlu1 %1796 }
 0x281   :  { %v1800_v7 = vsel %vm733_vm5, %v1797_v22, %v1799_v33  ;;  %v1801_v28 = vsel %vm733_vm5, %v1795_v55, %v1797_v22  ;;  %v2150_v55 = vpop.permute.xlu2 %2149 }
 0x282   :  { %v1808_v45 = vmul.f32 %v1801_v28, %v3452_v29  ;;  %v1809_v47 = vmul.f32 %v1800_v7, %v3453_v34  ;;  %v2574_v7 = vld [vmem:[%s3427_s8 + $0x20] sm:$0xf] }
 0x284   :  { %2543 = vmatpush.msk.msrb.mxu2 %vm54_vm0, %v1808_v45  ;;  %2545 = vmatpush.msk.msrb.mxu3 %vm54_vm0, %v1809_v47 }
 0x285   :  { %2540 = vmatmul.msk.f32.vlgmr.msrb.gmra.mxu0 %vm50_vm1, %v2538_v15  ;;  %2544 = vmatmul.msk.f32.vlgmr.msrb.gmra.mxu2 %vm50_vm1, %v2538_v15 }
 0x286   :  { %2546 = vmatmul.msk.f32.vlgmr.msrb.gmra.mxu3 %vm50_vm1, %v2538_v15  ;;  %v1916_v0 = vpop.permute.xlu0 %1915 }
 0x287   :  { %v1920_v44 = vsel %vm855_vm6, %v1916_v0, %v3204_v50  ;;  %v2547_v50 = vld [vmem:[%s3427_s8 + $0x14] sm:$0xf] }
 0x288   :  { %v1914_v49 = vpop.permute.xlu1 %1913  ;;  %v1926_v57 = vmul.f32 %v1920_v44, %v3454_v38 }
 0x289   :  { %v1918_v30 = vsel %vm855_vm6, %v1912_v23, %v1914_v49  ;;  %v1917_v51 = vsel %vm855_vm6, %v1914_v49, %v1916_v0  ;;  %v2556_v23 = vld [vmem:[%s3427_s8 + $0x18] sm:$0xf]  ;;  %v2261_v13 = vpop.permute.xlu2 %2260 }
 0x28a   :  { %v1924_v61 = vmul.f32 %v1918_v30, %v3455_v1  ;;  %v1925_v56 = vmul.f32 %v1917_v51, %v3456_v54  ;;  %2554 = vmatpush.msk.msra.mxu3 %vm54_vm0, %v1926_v57 }
 0x28c   :  { %2550 = vmatpush.msk.msra.mxu1 %vm54_vm0, %v1924_v61  ;;  %2552 = vmatpush.msk.msra.mxu2 %vm54_vm0, %v1925_v56 }
 0x28d   :  { %2549 = vmatmul.msk.f32.vlgmr.msra.gmra.mxu0 %vm50_vm1, %v2547_v50  ;;  %2551 = vmatmul.msk.f32.vlgmr.msra.gmra.mxu1 %vm50_vm1, %v2547_v50 }
 0x28e   :  { %2553 = vmatmul.msk.f32.vlgmr.msra.gmra.mxu2 %vm50_vm1, %v2547_v50  ;;  %2555 = vmatmul.msk.f32.vlgmr.msra.gmra.mxu3 %vm50_vm1, %v2547_v50  ;;  %v2029_v32 = vpop.permute.xlu0 %2028 }
 0x28f   :  { %v2035_v60 = vsel %vm977_vm7, %v2029_v32, %v2031_v21  ;;  %v2036_v33 = vsel %vm977_vm7, %v2027_v20, %v2029_v32 }
 0x290   :  { %v2033_v59 = vpop.permute.xlu1 %2032  ;;  %v2040_v2 = vmul.f32 %v2036_v33, %v3457_v14  ;;  %v2041_v40 = vmul.f32 %v2035_v60, %v3460_v39 }
 0x291   :  { %v2034_v6 = vsel %vm977_vm7, %v2031_v21, %v2033_v59  ;;  %v2037_v48 = vsel %vm977_vm7, %v2033_v59, %v2027_v20  ;;  %v2263_v12 = vpop.permute.xlu2 %2262  ;;  %v3464_v20 = vperm.slane %v2782_v43, 7 }
 0x292   :  { %v2042_v31 = vmul.f32 %v2034_v6, %v3458_v52  ;;  %v2043_v4 = vmul.f32 %v2037_v48, %v3459_v27  ;;  %2557 = vmatpush.msk.msrb.mxu0 %vm54_vm0, %v2040_v2  ;;  %2559 = vmatpush.msk.msrb.mxu1 %vm54_vm0, %v2041_v40  ;;  %v2270_v63 = vsel %vm1221_vm9, %v2261_v13, %v2263_v12 }
 0x293   :  { %v2274_v22 = vmul.f32 %v3059_v46, %v2270_v63 }
 0x294   :  { %2561 = vmatpush.msk.msrb.mxu2 %vm54_vm0, %v2042_v31  ;;  %2563 = vmatpush.msk.msrb.mxu3 %vm54_vm0, %v2043_v4 }
 0x295   :  { %2558 = vmatmul.msk.f32.vlgmr.msrb.gmra.mxu0 %vm50_vm1, %v2556_v23  ;;  %2560 = vmatmul.msk.f32.vlgmr.msrb.gmra.mxu1 %vm50_vm1, %v2556_v23 }
 0x296   :  { %2562 = vmatmul.msk.f32.vlgmr.msrb.gmra.mxu2 %vm50_vm1, %v2556_v23  ;;  %2564 = vmatmul.msk.f32.vlgmr.msrb.gmra.mxu3 %vm50_vm1, %v2556_v23  ;;  %v2148_v24 = vpop.permute.xlu0 %2147 }
 0x297   :  { %v2151_v36 = vsel %vm1099_vm8, %v2148_v24, %v2150_v55 }
 0x298   :  { %v2144_v37 = vpop.permute.xlu1 %2143  ;;  %v2159_v11 = vmul.f32 %v2151_v36, %v3461_v41 }
 0x299   :  { %v2154_v58 = vsel %vm1099_vm8, %v2150_v55, %v2144_v37 }
 0x29a   :  { %v2160_v25 = vmul.f32 %v2154_v58, %v3462_v8  ;;  %2570 = vmatpush.msk.msra.mxu2 %vm54_vm0, %v2159_v11 }
 0x29c   :  { %2572 = vmatpush.msk.msra.mxu3 %vm54_vm0, %v2160_v25 }
 0x29e   :  { %2571 = vmatmul.msk.f32.vlgmr.msra.gmra.mxu2 %vm50_vm1, %v2565_v35  ;;  %2573 = vmatmul.msk.f32.vlgmr.msra.gmra.mxu3 %vm50_vm1, %v2565_v35  ;;  %v2267_v9 = vpop.permute.xlu0 %2266 }
 0x29f   :  { %v2271_v53 = vsel %vm1221_vm9, %v2267_v9, %v2261_v13 }
 0x2a0   :  { %v2146_v10 = vpop.permute.xlu1 %2145  ;;  %v2277_v15 = vmul.f32 %v3102_v26, %v2271_v53 }
 0x2a1   :  { %v2152_v16 = vsel %vm1099_vm8, %v2146_v10, %v2148_v24  ;;  %v2153_v18 = vsel %vm1099_vm8, %v2144_v37, %v2146_v10 }
 0x2a2   :  { %v2157_v19 = vmul.f32 %v2153_v18, %v3463_v17  ;;  %v2158_v21 = vmul.f32 %v2152_v16, %v3464_v20  ;;  %2581 = vmatpush.msk.msrb.mxu3 %vm54_vm0, %v2277_v15 }
 0x2a4   :  { %2566 = vmatpush.msk.msra.mxu0 %vm54_vm0, %v2157_v19  ;;  %2568 = vmatpush.msk.msra.mxu1 %vm54_vm0, %v2158_v21 }
 0x2a5   :  { %2567 = vmatmul.msk.f32.vlgmr.msra.gmra.mxu0 %vm50_vm1, %v2565_v35  ;;  %2569 = vmatmul.msk.f32.vlgmr.msra.gmra.mxu1 %vm50_vm1, %v2565_v35 }
 0x2a6   :  { %2575 = vmatpush.msk.msrb.mxu0 %vm54_vm0, %v2274_v22  ;;  %2582 = vmatmul.msk.f32.vlgmr.msrb.gmra.mxu3 %vm50_vm1, %v2574_v7 }
 0x2a8   :  { %v2265_v43 = vpop.permute.xlu1 %2264 }
 0x2a9   :  { %v2268_v62 = vsel %vm1221_vm9, %v2265_v43, %v2267_v9  ;;  %v2269_v46 = vsel %vm1221_vm9, %v2263_v12, %v2265_v43 }
 0x2aa   :  { %v2275_v26 = vmul.f32 %v3066_v3, %v2269_v46  ;;  %v2276_v28 = vmul.f32 %v3097_v5, %v2268_v62 }
 0x2ac   :  { %2577 = vmatpush.msk.msrb.mxu1 %vm54_vm0, %v2275_v26  ;;  %2579 = vmatpush.msk.msrb.mxu2 %vm54_vm0, %v2276_v28 }
 0x2ad   :  { %2576 = vmatmul.msk.f32.vlgmr.msrb.gmra.mxu0 %vm50_vm1, %v2574_v7  ;;  %2578 = vmatmul.msk.f32.vlgmr.msrb.gmra.mxu1 %vm50_vm1, %v2574_v7 }
 0x2ae   :  { %2580 = vmatmul.msk.f32.vlgmr.msrb.gmra.mxu2 %vm50_vm1, %v2574_v7 }
 0x2da   :  { %v1400_v29 = vpop.f32.mrf.mxu0  ;;  %v1420_v45 = vpop.f32.mrf.mxu1 }
 0x2e4   :  { %v1495_v34 = vpop.f32.mrf.mxu0  ;;  %v1515_v0 = vpop.f32.mrf.mxu1 }
 0x2e5   :  { %v1516_v6 = vadd.f32 %v1515_v0, %v1420_v45  ;;  %v1496_v2 = vadd.f32 %v1495_v34, %v1400_v29  ;;  %v2381_v29 = vpop.permute.xlu0 %2380 }
 0x2e8   :  { %v1440_v47 = vpop.f32.mrf.mxu2  ;;  %v1460_v42 = vpop.f32.mrf.mxu3 }
 0x2ec   :  { %v1628_v5 = vpop.f32.mrf.mxu1 }
 0x2ed   :  { %v1672_v27 = vadd.f32 %v1628_v5, %v1516_v6 }
 0x2f0   :  { %v1535_v49 = vpop.f32.mrf.mxu2  ;;  %v1555_v3 = vpop.f32.mrf.mxu3 }
 0x2f1   :  { %v1608_v44 = vpop.f32.mrf.mxu0  ;;  %v1556_v31 = vadd.f32 %v1555_v3, %v1460_v42  ;;  %v1536_v8 = vadd.f32 %v1535_v49, %v1440_v47 }
 0x2f2   :  { %v1671_v4 = vadd.f32 %v1608_v44, %v1496_v2 }
 0x2f4   :  { %v1745_v57 = vpop.f32.mrf.mxu1 }
 0x2f5   :  { %v1789_v24 = vadd.f32 %v1745_v57, %v1672_v27 }
 0x2f8   :  { %v1648_v30 = vpop.f32.mrf.mxu2  ;;  %v1668_v51 = vpop.f32.mrf.mxu3 }
 0x2f9   :  { %v1674_v39 = vadd.f32 %v1668_v51, %v1556_v31  ;;  %v1673_v9 = vadd.f32 %v1648_v30, %v1536_v8 }
 0x2fa   :  { %v1725_v38 = vpop.f32.mrf.mxu0 }
 0x2fb   :  { %v1788_v23 = vadd.f32 %v1725_v38, %v1671_v4 }
 0x2fc   :  { %v1862_v54 = vpop.f32.mrf.mxu1 }
 0x2fd   :  { %v1906_v25 = vadd.f32 %v1862_v54, %v1789_v24 }
 0x300   :  { %v1765_v55 = vpop.f32.mrf.mxu2 }
 0x301   :  { %v1785_v1 = vpop.f32.mrf.mxu3  ;;  %v1790_v16 = vadd.f32 %v1765_v55, %v1673_v9 }
 0x302   :  { %v1842_v61 = vpop.f32.mrf.mxu0  ;;  %v1791_v13 = vadd.f32 %v1785_v1, %v1674_v39 }
 0x303   :  { %v1905_v58 = vadd.f32 %v1842_v61, %v1788_v23 }
 0x308   :  { %v1882_v50 = vpop.f32.mrf.mxu2 }
 0x309   :  { %v1902_v56 = vpop.f32.mrf.mxu3  ;;  %v1907_v20 = vadd.f32 %v1882_v50, %v1790_v16 }
 0x30a   :  { %v1959_v32 = vpop.f32.mrf.mxu0  ;;  %v1979_v59 = vpop.f32.mrf.mxu1  ;;  %v1908_v41 = vadd.f32 %v1902_v56, %v1791_v13 }
 0x30b   :  { %v2022_v35 = vadd.f32 %v1959_v32, %v1905_v58  ;;  %v2023_v10 = vadd.f32 %v1979_v59, %v1906_v25 }
 0x311   :  { %v2019_v60 = vpop.f32.mrf.mxu3  ;;  %v1999_v33 = vpop.f32.mrf.mxu2 }
 0x312   :  { %v2076_v48 = vpop.f32.mrf.mxu0  ;;  %v2096_v52 = vpop.f32.mrf.mxu1  ;;  %v2025_v12 = vadd.f32 %v2019_v60, %v1908_v41  ;;  %v2024_v26 = vadd.f32 %v1999_v33, %v1907_v20 }
 0x313   :  { %v2139_v53 = vadd.f32 %v2076_v48, %v2022_v35  ;;  %v2140_v18 = vadd.f32 %v2096_v52, %v2023_v10 }
 0x319   :  { %v2136_v14 = vpop.f32.mrf.mxu3  ;;  %v2116_v40 = vpop.f32.mrf.mxu2 }
 0x31a   :  { %v2142_v63 = vadd.f32 %v2136_v14, %v2025_v12  ;;  %v2141_v45 = vadd.f32 %v2116_v40, %v2024_v26 }
 0x321   :  { %v2253_v37 = vpop.f32.mrf.mxu3  ;;  %v2233_v15 = vpop.f32.mrf.mxu2 }
 0x322   :  { %v2193_v36 = vpop.f32.mrf.mxu0  ;;  %v2213_v11 = vpop.f32.mrf.mxu1  ;;  %v2259_v17 = vadd.f32 %v2253_v37, %v2142_v63  ;;  %v2258_v0 = vadd.f32 %v2233_v15, %v2141_v45 }
 0x323   :  { %v2256_v19 = vadd.f32 %v2193_v36, %v2139_v53  ;;  %v2257_v21 = vadd.f32 %v2213_v11, %v2140_v18 }
 0x329   :  { %v2370_v22 = vpop.f32.mrf.mxu3 }
 0x32a   :  { %v2310_v7 = vpop.f32.mrf.mxu0  ;;  %v2376_v43 = vadd.f32 %v2370_v22, %v2259_v17  ;;  %v2330_v46 = vpop.f32.mrf.mxu1 }
 0x32b   :  { %v2373_v62 = vadd.f32 %v2310_v7, %v2256_v19  ;;  %v2374_v28 = vadd.f32 %v2330_v46, %v2257_v21 }
 0x32c   :  { %v2386_v34 = vadd.f32 %v2381_v29, %v2376_v43 }
 0x32d   :  { %v2383_v47 = vadd.f32 %v2381_v29, %v2373_v62  ;;  %v2384_v42 = vadd.f32 %v2381_v29, %v2374_v28 }
 0x32e   :  { %v2390_v44 = vmax.f32 %v2386_v34, 0.0 }
 0x32f   :  { %v2388_v49 = vmax.f32 %v2384_v42, 0.0  ;;  %v2387_v5 = vmax.f32 %v2383_v47, 0.0 }
 0x330   :  { %v2396_v55 = vrot.slane %v2390_v44, 4 }
 0x331   :  { %v2350_v3 = vpop.f32.mrf.mxu2  ;;  %v2395_v30 = vrot.slane %v2388_v49, 4 }
 0x332   :  { %v2375_v51 = vadd.f32 %v2350_v3, %v2258_v0 }
 0x333   :  { %v2397_v38 = vsel %vm54_vm0, %v2387_v5, %v2395_v30 }
 0x334   :  { %v2385_v57 = vadd.f32 %v2381_v29, %v2375_v51  ;;  %2401 = vst [vmem:[%s3428_s10] sm:$0xff] %v2397_v38 }
 0x336   :  { %v2389_v1 = vmax.f32 %v2385_v57, 0.0 }
 0x338   :  { %v2398_v61 = vsel %vm54_vm0, %v2389_v1, %v2396_v55 }
 0x339   :  { %2402 = vst [vmem:[%s3428_s10 + $0x8] sm:$0xff] %v2398_v61 }

</bundles_post_ra>
